<compile_context>
chip_gen: v5e
topology: v5e:2x2
jax: 0.10.0
libtpu: 0.0.40
codegen_flags: <defaults>
</compile_context>

<pallas_src>
import functools

import jax
import jax.numpy as jnp
from jax import lax
from jax.experimental import pallas as pl
from jax.experimental.pallas import tpu as pltpu

LANE = 128
IDX_COLS = 8           # packed index array columns (5 used, 3 zero pad)
SMALL_K = 8            # tables with dim_in <= SMALL_K use the VPU select path (day_bin)
EMB_OUT = 100          # every table's embedding width

SPATIAL_EMB_DIMS = [("G_X", 256, EMB_OUT), ("G_Y", 256, EMB_OUT)]
TEMPORAL_EMB_DIMS = [("day_bin", 7, EMB_OUT), ("hour_bin", 24, EMB_OUT),
                     ("time_bin", 288, EMB_OUT)]
ALL_EMB_DIMS = SPATIAL_EMB_DIMS + TEMPORAL_EMB_DIMS
NUM_SP = len(SPATIAL_EMB_DIMS)
NUM_TP = len(TEMPORAL_EMB_DIMS)
NUM_TABLES = NUM_SP + NUM_TP
SP_WIDTH = NUM_SP * EMB_OUT      # 200
TP_WIDTH = NUM_TP * EMB_OUT      # 300
SP_COLS = -(-SP_WIDTH // LANE)   # 2 lane-columns
TP_COLS = -(-TP_WIDTH // LANE)   # 3 lane-columns


def _round_up(x, m):
    return ((x + m - 1) // m) * m


def _fused_embed_kernel(idx_ref, *refs, dim_ins, num_sp):
    """Fused 5-table embedding gather writing compact concatenated outputs.

    idx_ref : (tile_n, IDX_COLS) int32 -- column t holds the indices of table t
    refs    : (tab_0 .. tab_4, sp_out, tp_out)
      small table (day_bin) : (dim_in, LANE) float32
      big tables            : (dim_in_pad, 3*LANE) bfloat16 -- exact 3-way bf16
                              split (hi|mid|lo) of the f32 table, columns
                              pre-rolled so the 100 valid values already sit at
                              this table's lane offset inside its output slab.
      sp_out : (tile_n, 200) float32    tp_out : (tile_n, 300) float32
    """
    num_tables = len(dim_ins)
    tab_refs = refs[:num_tables]
    sp_ref = refs[num_tables]
    tp_ref = refs[num_tables + 1]
    tile_n = idx_ref.shape[0]

    lanes = lax.broadcasted_iota(jnp.int32, (tile_n, LANE), 1)
    sp_cols = [jnp.zeros((tile_n, LANE), jnp.float32) for _ in range(SP_COLS)]
    tp_cols = [jnp.zeros((tile_n, LANE), jnp.float32) for _ in range(TP_COLS)]

    for t in range(num_tables):
        dim_in = dim_ins[t]
        tab_ref = tab_refs[t]
        idx_col = idx_ref[:, t:t + 1]                       # (tile_n, 1) int32

        if dim_in <= SMALL_K:
            # day_bin (K=7): unrolled VPU select-accumulate, no MXU, bit exact.
            idx_b = jnp.broadcast_to(idx_col, (tile_n, LANE))
            piece = jnp.zeros((tile_n, LANE), jnp.float32)
            for k in range(dim_in):
                piece = jnp.where(idx_b == k, tab_ref[k:k + 1, :], piece)
        else:
            # bf16 one-hot x exact 3-way bf16 table split, accumulated in f32:
            # bit-exact gather in 3 DEFAULT-precision MXU passes (vs 6 for HIGHEST).
            oh = (idx_col == lax.broadcasted_iota(jnp.int32, (tile_n, dim_in), 1)
                  ).astype(jnp.bfloat16)
            piece = jnp.dot(oh, tab_ref[:, 0:LANE],
                            preferred_element_type=jnp.float32)
            piece = piece + jnp.dot(oh, tab_ref[:, LANE:2 * LANE],
                                    preferred_element_type=jnp.float32)
            piece = piece + jnp.dot(oh, tab_ref[:, 2 * LANE:3 * LANE],
                                    preferred_element_type=jnp.float32)

        # Place the (pre-rolled) 100-wide feature at its slab offset inside the
        # compact concatenated row using lane masks only (no unaligned stores).
        if t < num_sp:
            cols, off = sp_cols, t * EMB_OUT
        else:
            cols, off = tp_cols, (t - num_sp) * EMB_OUT
        c0, l0 = off // LANE, off % LANE
        if l0 == 0:
            cols[c0] = cols[c0] + piece
        else:
            cols[c0] = cols[c0] + jnp.where(lanes >= l0, piece, 0.0)
            cols[c0 + 1] = cols[c0 + 1] + jnp.where(
                lanes < l0 + EMB_OUT - LANE, piece, 0.0)

    # Lane-aligned (128-offset) stores of the compact rows; only the final tail
    # of each output (200 % 128, 300 % 128) is a masked store.
    for c in range(SP_COLS):
        w = min(LANE, SP_WIDTH - c * LANE)
        sp_ref[:, c * LANE:c * LANE + w] = sp_cols[c][:, :w]
    for c in range(TP_COLS):
        w = min(LANE, TP_WIDTH - c * LANE)
        tp_ref[:, c * LANE:c * LANE + w] = tp_cols[c][:, :w]


def fused_embed_concat(indices_list, kernel_tables, dim_ins, *, tile_n=512):
    """Single pallas_call over all 5 tables.

    indices_list : list of [N] int arrays, order = ALL_EMB_DIMS
    kernel_tables: kernel-ready tables (see SpatialTemporal.__init__), same order
    Returns (V_sp [N, 200], V_tp [N, 300]) -- already compact / concatenated.
    """
    n = int(indices_list[0].shape[0])
    n_pad = _round_up(max(n, 1), 8)
    tile = min(tile_n, n_pad)
    # Prefer >= 2 grid steps so the "parallel" axis can shard across both
    # TensorCores on megacore parts (v7x).
    if n_pad // tile < 2 and n_pad >= 16:
        tile = _round_up((n_pad + 1) // 2, 8)
    n_pad = _round_up(n_pad, tile)
    grid = n_pad // tile

    # Pack all index vectors into one [n_pad, IDX_COLS] int32 array with a
    # single fused stack+pad (one DMA stream, no per-column updates).
    idx = jnp.stack(
        [jnp.asarray(v).reshape(-1).astype(jnp.int32) for v in indices_list],
        axis=1)
    idx = jnp.pad(idx, ((0, n_pad - n), (0, IDX_COLS - NUM_TABLES)))

    kernel = functools.partial(_fused_embed_kernel, dim_ins=tuple(dim_ins),
                               num_sp=NUM_SP)

    in_specs = [pl.BlockSpec((tile, IDX_COLS), lambda i: (i, 0))]
    in_specs += [pl.BlockSpec(tab.shape, lambda i: (0, 0)) for tab in kernel_tables]
    out_specs = [
        pl.BlockSpec((tile, SP_WIDTH), lambda i: (i, 0)),
        pl.BlockSpec((tile, TP_WIDTH), lambda i: (i, 0)),
    ]
    out_shape = (
        jax.ShapeDtypeStruct((n_pad, SP_WIDTH), jnp.float32),
        jax.ShapeDtypeStruct((n_pad, TP_WIDTH), jnp.float32),
    )

    sp_pad, tp_pad = pl.pallas_call(
        kernel,
        out_shape=out_shape,
        grid_spec=pltpu.PrefetchScalarGridSpec(
            num_scalar_prefetch=0,
            grid=(grid,),
            in_specs=in_specs,
            out_specs=out_specs,
        ),
        compiler_params=pltpu.CompilerParams(dimension_semantics=("parallel",)),
    )(idx, *kernel_tables)
    # Only a row slice remains in the wrapper (no column slice / concat pass).
    return sp_pad[:n], tp_pad[:n]


def _split_bf16_exact(tab_f32):
    """Exact 3-way bf16 decomposition: hi + mid + lo == tab, bit-exact in f32."""
    hi = tab_f32.astype(jnp.bfloat16)
    r1 = tab_f32 - hi.astype(jnp.float32)
    mid = r1.astype(jnp.bfloat16)
    r2 = r1 - mid.astype(jnp.float32)
    lo = r2.astype(jnp.bfloat16)
    return jnp.concatenate([hi, mid, lo], axis=1)         # (K, 3*LANE) bf16


class SpatialTemporal:
    """JAX/Pallas port of ETA_Model.models.SpatialTemporal (forward only)."""

    def __init__(self, key):
        self.tables = {}          # original f32 weights (reference semantics)
        self._kernel_tables = []  # kernel-ready tables, order = ALL_EMB_DIMS
        self._dim_ins = []
        slab_offsets = ([t * EMB_OUT for t in range(NUM_SP)]
                        + [t * EMB_OUT for t in range(NUM_TP)])
        for i, (name, dim_in, dim_out) in enumerate(ALL_EMB_DIMS):
            key, sub = jax.random.split(key)
            # nn.init.uniform_(weight, a=-1, b=1)
            tab = jax.random.uniform(sub, (dim_in, dim_out), dtype=jnp.float32,
                                     minval=-1.0, maxval=1.0)
            self.tables[name] = tab
            padded = jnp.pad(tab, ((0, 0), (0, LANE - dim_out)))   # 100 -> 128 cols
            # Pre-roll columns so the gather result already sits at this table's
            # lane offset inside the concatenated output row (no in-kernel shifts).
            l0 = slab_offsets[i] % LANE
            if l0:
                padded = jnp.roll(padded, l0, axis=1)
            if dim_in <= SMALL_K:
                ktab = padded                                       # f32, VPU path
                k_rows = dim_in
            else:
                k_rows = _round_up(dim_in, 16)                      # bf16 sublane pack
                padded = jnp.pad(padded, ((0, k_rows - dim_in), (0, 0)))
                ktab = _split_bf16_exact(padded)                    # (k_rows, 384) bf16
            self._kernel_tables.append(ktab)
            self._dim_ins.append(k_rows)
        self._dim_ins = tuple(self._dim_ins)

    def forward(self, stats, temporal, spatial):
        del stats  # unused by the reference forward as well
        indices = [
            spatial["G_X"], spatial["G_Y"],
            temporal["day_bin"], temporal["hour_bin"], temporal["time_bin"],
        ]
        V_sp, V_tp = fused_embed_concat(indices, self._kernel_tables, self._dim_ins)
        return V_sp, V_tp


def _reference(model, temporal, spatial):
    """Pure-JAX reference (embedding lookup + concat), mirrors torch semantics."""
    V_tp = jnp.concatenate(
        [jnp.take(model.tables[name], jnp.asarray(temporal[name]).reshape(-1), axis=0)
         for name, _, _ in TEMPORAL_EMB_DIMS], axis=1)
    V_sp = jnp.concatenate(
        [jnp.take(model.tables[name], jnp.asarray(spatial[name]).reshape(-1), axis=0)
         for name, _, _ in SPATIAL_EMB_DIMS], axis=1)
    return V_sp, V_tp


if __name__ == "__main__":
    key = jax.random.PRNGKey(0)
    key, k_model = jax.random.split(key)
    model = SpatialTemporal(k_model)

    N = 16  # number of "cells" (flattened batch), small test size

    def rand_idx(k, hi):
        return jax.random.randint(k, (N,), 0, hi, dtype=jnp.int32)

    keys = jax.random.split(key, 6)
    temporal = {
        "day_bin": rand_idx(keys[0], 7),
        "hour_bin": rand_idx(keys[1], 24),
        "time_bin": rand_idx(keys[2], 288),
    }
    spatial = {
        "G_X": rand_idx(keys[3], 256),
        "G_Y": rand_idx(keys[4], 256),
    }
    stats = jax.random.normal(keys[5], (N, 4), dtype=jnp.float32)  # unused, as in torch

    V_sp, V_tp = model.forward(stats, temporal, spatial)
    V_sp = jax.block_until_ready(V_sp)
    V_tp = jax.block_until_ready(V_tp)

    assert V_sp.shape == (N, SP_WIDTH) and V_tp.shape == (N, TP_WIDTH)

    ref_sp, ref_tp = _reference(model, temporal, spatial)
    assert jnp.allclose(V_sp, ref_sp, atol=1e-6), "V_sp mismatch vs reference"
    assert jnp.allclose(V_tp, ref_tp, atol=1e-6), "V_tp mismatch vs reference"

    print("KERNEL_OK")
</pallas_src>

<mosaic_0001>
module attributes {stable_mosaic.version = 11 : i64} {
  func.func @_fused_embed_kernel(%arg0: i32, %arg1: memref<8x8xi32, #tpu.memory_space<vmem>>, %arg2: memref<256x384xbf16, #tpu.memory_space<vmem>>, %arg3: memref<256x384xbf16, #tpu.memory_space<vmem>>, %arg4: memref<7x128xf32, #tpu.memory_space<vmem>>, %arg5: memref<32x384xbf16, #tpu.memory_space<vmem>>, %arg6: memref<288x384xbf16, #tpu.memory_space<vmem>>, %arg7: memref<8x200xf32, #tpu.memory_space<vmem>>, %arg8: memref<8x300xf32, #tpu.memory_space<vmem>>) attributes {dimension_semantics = [#tpu.dimension_semantics<parallel>], iteration_bounds = array<i64: 2>, scalar_prefetch = 0 : i64, scratch_operands = 0 : i64, tpu.core_type = #tpu.core_type<tc>, window_params = [{transform_indices = @transform_0, window_bounds = array<i64: 8, 8>}, {pipeline_mode = #tpu.pipeline_mode<synchronous>, transform_indices = @transform_1, window_bounds = array<i64: 256, 384>}, {pipeline_mode = #tpu.pipeline_mode<synchronous>, transform_indices = @transform_2, window_bounds = array<i64: 256, 384>}, {pipeline_mode = #tpu.pipeline_mode<synchronous>, transform_indices = @transform_3, window_bounds = array<i64: 7, 128>}, {pipeline_mode = #tpu.pipeline_mode<synchronous>, transform_indices = @transform_4, window_bounds = array<i64: 32, 384>}, {pipeline_mode = #tpu.pipeline_mode<synchronous>, transform_indices = @transform_5, window_bounds = array<i64: 288, 384>}, {transform_indices = @transform_6, window_bounds = array<i64: 8, 200>}, {transform_indices = @transform_7, window_bounds = array<i64: 8, 300>}]} {
    %0 = tpu.iota {dimensions = array<i32: 1>} : vector<8x128xi32>
    %cst = arith.constant 0.000000e+00 : f32
    %1 = vector.broadcast %cst : f32 to vector<8x128xf32>
    %cst_0 = arith.constant 0.000000e+00 : f32
    %2 = vector.broadcast %cst_0 : f32 to vector<8x128xf32>
    %cst_1 = arith.constant 0.000000e+00 : f32
    %3 = vector.broadcast %cst_1 : f32 to vector<8x128xf32>
    %cst_2 = arith.constant 0.000000e+00 : f32
    %4 = vector.broadcast %cst_2 : f32 to vector<8x128xf32>
    %cst_3 = arith.constant 0.000000e+00 : f32
    %5 = vector.broadcast %cst_3 : f32 to vector<8x128xf32>
    %c0 = arith.constant 0 : index
    %c0_4 = arith.constant 0 : index
    %6 = vector.load %arg1[%c0, %c0_4] : memref<8x8xi32, #tpu.memory_space<vmem>>, vector<8x1xi32>
    %7 = tpu.iota {dimensions = array<i32: 1>} : vector<8x256xi32>
    %8 = vector.broadcast %6 : vector<8x1xi32> to vector<8x256xi32>
    %9 = arith.cmpi eq, %8, %7 : vector<8x256xi32>
    %10 = arith.extui %9 : vector<8x256xi1> to vector<8x256xi32>
    %11 = arith.sitofp %10 : vector<8x256xi32> to vector<8x256xf32>
    %12 = arith.truncf %11 : vector<8x256xf32> to vector<8x256xbf16>
    %c0_5 = arith.constant 0 : index
    %c0_6 = arith.constant 0 : index
    %13 = vector.load %arg2[%c0_5, %c0_6] : memref<256x384xbf16, #tpu.memory_space<vmem>>, vector<256x128xbf16>
    %cst_7 = arith.constant dense<0.000000e+00> : vector<8x128xf32>
    %14 = tpu.matmul %12, %13, %cst_7 {dimension_numbers = #tpu.dot_dimension_numbers<[1], [0], [0], [1], [0, 0, 1, 1], [], []>} : vector<8x256xbf16>, vector<256x128xbf16>, vector<8x128xf32> -> vector<8x128xf32>
    %c0_8 = arith.constant 0 : index
    %c128 = arith.constant 128 : index
    %15 = vector.load %arg2[%c0_8, %c128] : memref<256x384xbf16, #tpu.memory_space<vmem>>, vector<256x128xbf16>
    %cst_9 = arith.constant dense<0.000000e+00> : vector<8x128xf32>
    %16 = tpu.matmul %12, %15, %cst_9 {dimension_numbers = #tpu.dot_dimension_numbers<[1], [0], [0], [1], [0, 0, 1, 1], [], []>} : vector<8x256xbf16>, vector<256x128xbf16>, vector<8x128xf32> -> vector<8x128xf32>
    %17 = arith.addf %14, %16 : vector<8x128xf32>
    %c0_10 = arith.constant 0 : index
    %c256 = arith.constant 256 : index
    %18 = vector.load %arg2[%c0_10, %c256] : memref<256x384xbf16, #tpu.memory_space<vmem>>, vector<256x128xbf16>
    %cst_11 = arith.constant dense<0.000000e+00> : vector<8x128xf32>
    %19 = tpu.matmul %12, %18, %cst_11 {dimension_numbers = #tpu.dot_dimension_numbers<[1], [0], [0], [1], [0, 0, 1, 1], [], []>} : vector<8x256xbf16>, vector<256x128xbf16>, vector<8x128xf32> -> vector<8x128xf32>
    %20 = arith.addf %17, %19 : vector<8x128xf32>
    %21 = arith.addf %1, %20 : vector<8x128xf32>
    %c0_12 = arith.constant 0 : index
    %c1 = arith.constant 1 : index
    %22 = vector.load %arg1[%c0_12, %c1] : memref<8x8xi32, #tpu.memory_space<vmem>>, vector<8x1xi32>
    %23 = tpu.iota {dimensions = array<i32: 1>} : vector<8x256xi32>
    %24 = vector.broadcast %22 : vector<8x1xi32> to vector<8x256xi32>
    %25 = arith.cmpi eq, %24, %23 : vector<8x256xi32>
    %26 = arith.extui %25 : vector<8x256xi1> to vector<8x256xi32>
    %27 = arith.sitofp %26 : vector<8x256xi32> to vector<8x256xf32>
    %28 = arith.truncf %27 : vector<8x256xf32> to vector<8x256xbf16>
    %c0_13 = arith.constant 0 : index
    %c0_14 = arith.constant 0 : index
    %29 = vector.load %arg3[%c0_13, %c0_14] : memref<256x384xbf16, #tpu.memory_space<vmem>>, vector<256x128xbf16>
    %cst_15 = arith.constant dense<0.000000e+00> : vector<8x128xf32>
    %30 = tpu.matmul %28, %29, %cst_15 {dimension_numbers = #tpu.dot_dimension_numbers<[1], [0], [0], [1], [0, 0, 1, 1], [], []>} : vector<8x256xbf16>, vector<256x128xbf16>, vector<8x128xf32> -> vector<8x128xf32>
    %c0_16 = arith.constant 0 : index
    %c128_17 = arith.constant 128 : index
    %31 = vector.load %arg3[%c0_16, %c128_17] : memref<256x384xbf16, #tpu.memory_space<vmem>>, vector<256x128xbf16>
    %cst_18 = arith.constant dense<0.000000e+00> : vector<8x128xf32>
    %32 = tpu.matmul %28, %31, %cst_18 {dimension_numbers = #tpu.dot_dimension_numbers<[1], [0], [0], [1], [0, 0, 1, 1], [], []>} : vector<8x256xbf16>, vector<256x128xbf16>, vector<8x128xf32> -> vector<8x128xf32>
    %33 = arith.addf %30, %32 : vector<8x128xf32>
    %c0_19 = arith.constant 0 : index
    %c256_20 = arith.constant 256 : index
    %34 = vector.load %arg3[%c0_19, %c256_20] : memref<256x384xbf16, #tpu.memory_space<vmem>>, vector<256x128xbf16>
    %cst_21 = arith.constant dense<0.000000e+00> : vector<8x128xf32>
    %35 = tpu.matmul %28, %34, %cst_21 {dimension_numbers = #tpu.dot_dimension_numbers<[1], [0], [0], [1], [0, 0, 1, 1], [], []>} : vector<8x256xbf16>, vector<256x128xbf16>, vector<8x128xf32> -> vector<8x128xf32>
    %36 = arith.addf %33, %35 : vector<8x128xf32>
    %c100_i32 = arith.constant 100 : i32
    %37 = vector.broadcast %c100_i32 : i32 to vector<8x128xi32>
    %38 = arith.cmpi sge, %0, %37 : vector<8x128xi32>
    %cst_22 = arith.constant 0.000000e+00 : f32
    %39 = vector.broadcast %cst_22 : f32 to vector<8x128xf32>
    %40 = arith.select %38, %36, %39 : vector<8x128xi1>, vector<8x128xf32>
    %41 = arith.addf %21, %40 : vector<8x128xf32>
    %c72_i32 = arith.constant 72 : i32
    %42 = vector.broadcast %c72_i32 : i32 to vector<8x128xi32>
    %43 = arith.cmpi slt, %0, %42 : vector<8x128xi32>
    %cst_23 = arith.constant 0.000000e+00 : f32
    %44 = vector.broadcast %cst_23 : f32 to vector<8x128xf32>
    %45 = arith.select %43, %36, %44 : vector<8x128xi1>, vector<8x128xf32>
    %46 = arith.addf %2, %45 : vector<8x128xf32>
    %c0_24 = arith.constant 0 : index
    %c2 = arith.constant 2 : index
    %47 = vector.load %arg1[%c0_24, %c2] : memref<8x8xi32, #tpu.memory_space<vmem>>, vector<8x1xi32>
    %48 = vector.shape_cast %47 : vector<8x1xi32> to vector<8x1xi32>
    %49 = vector.broadcast %48 : vector<8x1xi32> to vector<8x128xi32>
    %cst_25 = arith.constant 0.000000e+00 : f32
    %50 = vector.broadcast %cst_25 : f32 to vector<8x128xf32>
    %c0_i32 = arith.constant 0 : i32
    %51 = vector.broadcast %c0_i32 : i32 to vector<8x128xi32>
    %52 = arith.cmpi eq, %49, %51 : vector<8x128xi32>
    %c0_26 = arith.constant 0 : index
    %c0_27 = arith.constant 0 : index
    %53 = vector.load %arg4[%c0_26, %c0_27] : memref<7x128xf32, #tpu.memory_space<vmem>>, vector<1x128xf32>
    %54 = vector.shape_cast %53 : vector<1x128xf32> to vector<1x128xf32>
    %55 = vector.broadcast %54 : vector<1x128xf32> to vector<8x128xf32>
    %56 = arith.select %52, %55, %50 : vector<8x128xi1>, vector<8x128xf32>
    %c1_i32 = arith.constant 1 : i32
    %57 = vector.broadcast %c1_i32 : i32 to vector<8x128xi32>
    %58 = arith.cmpi eq, %49, %57 : vector<8x128xi32>
    %c1_28 = arith.constant 1 : index
    %c0_29 = arith.constant 0 : index
    %59 = vector.load %arg4[%c1_28, %c0_29] : memref<7x128xf32, #tpu.memory_space<vmem>>, vector<1x128xf32>
    %60 = vector.shape_cast %59 : vector<1x128xf32> to vector<1x128xf32>
    %61 = vector.broadcast %60 : vector<1x128xf32> to vector<8x128xf32>
    %62 = arith.select %58, %61, %56 : vector<8x128xi1>, vector<8x128xf32>
    %c2_i32 = arith.constant 2 : i32
    %63 = vector.broadcast %c2_i32 : i32 to vector<8x128xi32>
    %64 = arith.cmpi eq, %49, %63 : vector<8x128xi32>
    %c2_30 = arith.constant 2 : index
    %c0_31 = arith.constant 0 : index
    %65 = vector.load %arg4[%c2_30, %c0_31] : memref<7x128xf32, #tpu.memory_space<vmem>>, vector<1x128xf32>
    %66 = vector.shape_cast %65 : vector<1x128xf32> to vector<1x128xf32>
    %67 = vector.broadcast %66 : vector<1x128xf32> to vector<8x128xf32>
    %68 = arith.select %64, %67, %62 : vector<8x128xi1>, vector<8x128xf32>
    %c3_i32 = arith.constant 3 : i32
    %69 = vector.broadcast %c3_i32 : i32 to vector<8x128xi32>
    %70 = arith.cmpi eq, %49, %69 : vector<8x128xi32>
    %c3 = arith.constant 3 : index
    %c0_32 = arith.constant 0 : index
    %71 = vector.load %arg4[%c3, %c0_32] : memref<7x128xf32, #tpu.memory_space<vmem>>, vector<1x128xf32>
    %72 = vector.shape_cast %71 : vector<1x128xf32> to vector<1x128xf32>
    %73 = vector.broadcast %72 : vector<1x128xf32> to vector<8x128xf32>
    %74 = arith.select %70, %73, %68 : vector<8x128xi1>, vector<8x128xf32>
    %c4_i32 = arith.constant 4 : i32
    %75 = vector.broadcast %c4_i32 : i32 to vector<8x128xi32>
    %76 = arith.cmpi eq, %49, %75 : vector<8x128xi32>
    %c4 = arith.constant 4 : index
    %c0_33 = arith.constant 0 : index
    %77 = vector.load %arg4[%c4, %c0_33] : memref<7x128xf32, #tpu.memory_space<vmem>>, vector<1x128xf32>
    %78 = vector.shape_cast %77 : vector<1x128xf32> to vector<1x128xf32>
    %79 = vector.broadcast %78 : vector<1x128xf32> to vector<8x128xf32>
    %80 = arith.select %76, %79, %74 : vector<8x128xi1>, vector<8x128xf32>
    %c5_i32 = arith.constant 5 : i32
    %81 = vector.broadcast %c5_i32 : i32 to vector<8x128xi32>
    %82 = arith.cmpi eq, %49, %81 : vector<8x128xi32>
    %c5 = arith.constant 5 : index
    %c0_34 = arith.constant 0 : index
    %83 = vector.load %arg4[%c5, %c0_34] : memref<7x128xf32, #tpu.memory_space<vmem>>, vector<1x128xf32>
    %84 = vector.shape_cast %83 : vector<1x128xf32> to vector<1x128xf32>
    %85 = vector.broadcast %84 : vector<1x128xf32> to vector<8x128xf32>
    %86 = arith.select %82, %85, %80 : vector<8x128xi1>, vector<8x128xf32>
    %c6_i32 = arith.constant 6 : i32
    %87 = vector.broadcast %c6_i32 : i32 to vector<8x128xi32>
    %88 = arith.cmpi eq, %49, %87 : vector<8x128xi32>
    %c6 = arith.constant 6 : index
    %c0_35 = arith.constant 0 : index
    %89 = vector.load %arg4[%c6, %c0_35] : memref<7x128xf32, #tpu.memory_space<vmem>>, vector<1x128xf32>
    %90 = vector.shape_cast %89 : vector<1x128xf32> to vector<1x128xf32>
    %91 = vector.broadcast %90 : vector<1x128xf32> to vector<8x128xf32>
    %92 = arith.select %88, %91, %86 : vector<8x128xi1>, vector<8x128xf32>
    %93 = arith.addf %3, %92 : vector<8x128xf32>
    %c0_36 = arith.constant 0 : index
    %c3_37 = arith.constant 3 : index
    %94 = vector.load %arg1[%c0_36, %c3_37] : memref<8x8xi32, #tpu.memory_space<vmem>>, vector<8x1xi32>
    %95 = tpu.iota {dimensions = array<i32: 1>} : vector<8x32xi32>
    %96 = vector.broadcast %94 : vector<8x1xi32> to vector<8x32xi32>
    %97 = arith.cmpi eq, %96, %95 : vector<8x32xi32>
    %98 = arith.extui %97 : vector<8x32xi1> to vector<8x32xi32>
    %99 = arith.sitofp %98 : vector<8x32xi32> to vector<8x32xf32>
    %100 = arith.truncf %99 : vector<8x32xf32> to vector<8x32xbf16>
    %c0_38 = arith.constant 0 : index
    %c0_39 = arith.constant 0 : index
    %101 = vector.load %arg5[%c0_38, %c0_39] : memref<32x384xbf16, #tpu.memory_space<vmem>>, vector<32x128xbf16>
    %cst_40 = arith.constant dense<0.000000e+00> : vector<8x128xf32>
    %102 = tpu.matmul %100, %101, %cst_40 {dimension_numbers = #tpu.dot_dimension_numbers<[1], [0], [0], [1], [0, 0, 1, 1], [], []>} : vector<8x32xbf16>, vector<32x128xbf16>, vector<8x128xf32> -> vector<8x128xf32>
    %c0_41 = arith.constant 0 : index
    %c128_42 = arith.constant 128 : index
    %103 = vector.load %arg5[%c0_41, %c128_42] : memref<32x384xbf16, #tpu.memory_space<vmem>>, vector<32x128xbf16>
    %cst_43 = arith.constant dense<0.000000e+00> : vector<8x128xf32>
    %104 = tpu.matmul %100, %103, %cst_43 {dimension_numbers = #tpu.dot_dimension_numbers<[1], [0], [0], [1], [0, 0, 1, 1], [], []>} : vector<8x32xbf16>, vector<32x128xbf16>, vector<8x128xf32> -> vector<8x128xf32>
    %105 = arith.addf %102, %104 : vector<8x128xf32>
    %c0_44 = arith.constant 0 : index
    %c256_45 = arith.constant 256 : index
    %106 = vector.load %arg5[%c0_44, %c256_45] : memref<32x384xbf16, #tpu.memory_space<vmem>>, vector<32x128xbf16>
    %cst_46 = arith.constant dense<0.000000e+00> : vector<8x128xf32>
    %107 = tpu.matmul %100, %106, %cst_46 {dimension_numbers = #tpu.dot_dimension_numbers<[1], [0], [0], [1], [0, 0, 1, 1], [], []>} : vector<8x32xbf16>, vector<32x128xbf16>, vector<8x128xf32> -> vector<8x128xf32>
    %108 = arith.addf %105, %107 : vector<8x128xf32>
    %c100_i32_47 = arith.constant 100 : i32
    %109 = vector.broadcast %c100_i32_47 : i32 to vector<8x128xi32>
    %110 = arith.cmpi sge, %0, %109 : vector<8x128xi32>
    %cst_48 = arith.constant 0.000000e+00 : f32
    %111 = vector.broadcast %cst_48 : f32 to vector<8x128xf32>
    %112 = arith.select %110, %108, %111 : vector<8x128xi1>, vector<8x128xf32>
    %113 = arith.addf %93, %112 : vector<8x128xf32>
    %c72_i32_49 = arith.constant 72 : i32
    %114 = vector.broadcast %c72_i32_49 : i32 to vector<8x128xi32>
    %115 = arith.cmpi slt, %0, %114 : vector<8x128xi32>
    %cst_50 = arith.constant 0.000000e+00 : f32
    %116 = vector.broadcast %cst_50 : f32 to vector<8x128xf32>
    %117 = arith.select %115, %108, %116 : vector<8x128xi1>, vector<8x128xf32>
    %118 = arith.addf %4, %117 : vector<8x128xf32>
    %c0_51 = arith.constant 0 : index
    %c4_52 = arith.constant 4 : index
    %119 = vector.load %arg1[%c0_51, %c4_52] : memref<8x8xi32, #tpu.memory_space<vmem>>, vector<8x1xi32>
    %120 = tpu.iota {dimensions = array<i32: 1>} : vector<8x288xi32>
    %121 = vector.broadcast %119 : vector<8x1xi32> to vector<8x288xi32>
    %122 = arith.cmpi eq, %121, %120 : vector<8x288xi32>
    %123 = arith.extui %122 : vector<8x288xi1> to vector<8x288xi32>
    %124 = arith.sitofp %123 : vector<8x288xi32> to vector<8x288xf32>
    %125 = arith.truncf %124 : vector<8x288xf32> to vector<8x288xbf16>
    %c0_53 = arith.constant 0 : index
    %c0_54 = arith.constant 0 : index
    %126 = vector.load %arg6[%c0_53, %c0_54] : memref<288x384xbf16, #tpu.memory_space<vmem>>, vector<288x128xbf16>
    %cst_55 = arith.constant dense<0.000000e+00> : vector<8x128xf32>
    %127 = tpu.matmul %125, %126, %cst_55 {dimension_numbers = #tpu.dot_dimension_numbers<[1], [0], [0], [1], [0, 0, 1, 1], [], []>} : vector<8x288xbf16>, vector<288x128xbf16>, vector<8x128xf32> -> vector<8x128xf32>
    %c0_56 = arith.constant 0 : index
    %c128_57 = arith.constant 128 : index
    %128 = vector.load %arg6[%c0_56, %c128_57] : memref<288x384xbf16, #tpu.memory_space<vmem>>, vector<288x128xbf16>
    %cst_58 = arith.constant dense<0.000000e+00> : vector<8x128xf32>
    %129 = tpu.matmul %125, %128, %cst_58 {dimension_numbers = #tpu.dot_dimension_numbers<[1], [0], [0], [1], [0, 0, 1, 1], [], []>} : vector<8x288xbf16>, vector<288x128xbf16>, vector<8x128xf32> -> vector<8x128xf32>
    %130 = arith.addf %127, %129 : vector<8x128xf32>
    %c0_59 = arith.constant 0 : index
    %c256_60 = arith.constant 256 : index
    %131 = vector.load %arg6[%c0_59, %c256_60] : memref<288x384xbf16, #tpu.memory_space<vmem>>, vector<288x128xbf16>
    %cst_61 = arith.constant dense<0.000000e+00> : vector<8x128xf32>
    %132 = tpu.matmul %125, %131, %cst_61 {dimension_numbers = #tpu.dot_dimension_numbers<[1], [0], [0], [1], [0, 0, 1, 1], [], []>} : vector<8x288xbf16>, vector<288x128xbf16>, vector<8x128xf32> -> vector<8x128xf32>
    %133 = arith.addf %130, %132 : vector<8x128xf32>
    %c72_i32_62 = arith.constant 72 : i32
    %134 = vector.broadcast %c72_i32_62 : i32 to vector<8x128xi32>
    %135 = arith.cmpi sge, %0, %134 : vector<8x128xi32>
    %cst_63 = arith.constant 0.000000e+00 : f32
    %136 = vector.broadcast %cst_63 : f32 to vector<8x128xf32>
    %137 = arith.select %135, %133, %136 : vector<8x128xi1>, vector<8x128xf32>
    %138 = arith.addf %118, %137 : vector<8x128xf32>
    %c44_i32 = arith.constant 44 : i32
    %139 = vector.broadcast %c44_i32 : i32 to vector<8x128xi32>
    %140 = arith.cmpi slt, %0, %139 : vector<8x128xi32>
    %cst_64 = arith.constant 0.000000e+00 : f32
    %141 = vector.broadcast %cst_64 : f32 to vector<8x128xf32>
    %142 = arith.select %140, %133, %141 : vector<8x128xi1>, vector<8x128xf32>
    %143 = arith.addf %5, %142 : vector<8x128xf32>
    %c0_65 = arith.constant 0 : index
    %c0_66 = arith.constant 0 : index
    %144 = vector.load %arg7[%c0_65, %c0_66] : memref<8x200xf32, #tpu.memory_space<vmem>>, vector<8x128xf32>
    tpu.vector_store %arg7[%c0_65, %c0_66], %41 {strides = array<i32>} : memref<8x200xf32, #tpu.memory_space<vmem>>, vector<8x128xf32>,
    %145 = vector.extract_strided_slice %46 {offsets = [0, 0], sizes = [8, 72], strides = [1, 1]} : vector<8x128xf32> to vector<8x72xf32>
    %c0_67 = arith.constant 0 : index
    %c128_68 = arith.constant 128 : index
    %146 = vector.load %arg7[%c0_67, %c128_68] : memref<8x200xf32, #tpu.memory_space<vmem>>, vector<8x72xf32>
    tpu.vector_store %arg7[%c0_67, %c128_68], %145 {strides = array<i32>} : memref<8x200xf32, #tpu.memory_space<vmem>>, vector<8x72xf32>,
    %c0_69 = arith.constant 0 : index
    %c0_70 = arith.constant 0 : index
    %147 = vector.load %arg8[%c0_69, %c0_70] : memref<8x300xf32, #tpu.memory_space<vmem>>, vector<8x128xf32>
    tpu.vector_store %arg8[%c0_69, %c0_70], %113 {strides = array<i32>} : memref<8x300xf32, #tpu.memory_space<vmem>>, vector<8x128xf32>,
    %c0_71 = arith.constant 0 : index
    %c128_72 = arith.constant 128 : index
    %148 = vector.load %arg8[%c0_71, %c128_72] : memref<8x300xf32, #tpu.memory_space<vmem>>, vector<8x128xf32>
    tpu.vector_store %arg8[%c0_71, %c128_72], %138 {strides = array<i32>} : memref<8x300xf32, #tpu.memory_space<vmem>>, vector<8x128xf32>,
    %149 = vector.extract_strided_slice %143 {offsets = [0, 0], sizes = [8, 44], strides = [1, 1]} : vector<8x128xf32> to vector<8x44xf32>
    %c0_73 = arith.constant 0 : index
    %c256_74 = arith.constant 256 : index
    %150 = vector.load %arg8[%c0_73, %c256_74] : memref<8x300xf32, #tpu.memory_space<vmem>>, vector<8x44xf32>
    tpu.vector_store %arg8[%c0_73, %c256_74], %149 {strides = array<i32>} : memref<8x300xf32, #tpu.memory_space<vmem>>, vector<8x44xf32>,
    return
  }
  func.func @transform_0(%arg0: i32) -> (i32, i32) {
    %c0_i32 = arith.constant 0 : i32
    %c0_i32_0 = arith.constant 0 : i32
    return %arg0, %c0_i32 : i32, i32
  }
  func.func @transform_1(%arg0: i32) -> (i32, i32) {
    %c0_i32 = arith.constant 0 : i32
    %c0_i32_0 = arith.constant 0 : i32
    %c0_i32_1 = arith.constant 0 : i32
    return %c0_i32, %c0_i32_0 : i32, i32
  }
  func.func @transform_2(%arg0: i32) -> (i32, i32) {
    %c0_i32 = arith.constant 0 : i32
    %c0_i32_0 = arith.constant 0 : i32
    %c0_i32_1 = arith.constant 0 : i32
    return %c0_i32, %c0_i32_0 : i32, i32
  }
  func.func @transform_3(%arg0: i32) -> (i32, i32) {
    %c0_i32 = arith.constant 0 : i32
    %c0_i32_0 = arith.constant 0 : i32
    %c0_i32_1 = arith.constant 0 : i32
    return %c0_i32, %c0_i32_0 : i32, i32
  }
  func.func @transform_4(%arg0: i32) -> (i32, i32) {
    %c0_i32 = arith.constant 0 : i32
    %c0_i32_0 = arith.constant 0 : i32
    %c0_i32_1 = arith.constant 0 : i32
    return %c0_i32, %c0_i32_0 : i32, i32
  }
  func.func @transform_5(%arg0: i32) -> (i32, i32) {
    %c0_i32 = arith.constant 0 : i32
    %c0_i32_0 = arith.constant 0 : i32
    %c0_i32_1 = arith.constant 0 : i32
    return %c0_i32, %c0_i32_0 : i32, i32
  }
  func.func @transform_6(%arg0: i32) -> (i32, i32) {
    %c0_i32 = arith.constant 0 : i32
    %c0_i32_0 = arith.constant 0 : i32
    return %arg0, %c0_i32 : i32, i32
  }
  func.func @transform_7(%arg0: i32) -> (i32, i32) {
    %c0_i32 = arith.constant 0 : i32
    %c0_i32_0 = arith.constant 0 : i32
    return %arg0, %c0_i32 : i32, i32
  }
}

</mosaic_0001>

<bundles_post_ra>
// kernel: tpu_custom_call.1
= control target key start
LH: loop header
LB: loop body
LE: loop exit
PB: predicated region body
PF: predicated region fallthrough
CT: control target
= control target key end

     0   :  { %s3754_s0 = inlined_call_operand.vmem [shape: s32[16,8], index: 0, kind: input, shape index: {}]   ;;  %s3755_s1 = inlined_call_operand.hbm [shape: bf16[256,384], index: 1, kind: input, shape index: {}]   ;;  %s3756_s2 = inlined_call_operand.hbm [shape: bf16[256,384], index: 2, kind: input, shape index: {}]   ;;  %s3757_s3 = inlined_call_operand.vmem [shape: f32[7,128], index: 3, kind: input, shape index: {}]   ;;  %s3758_s4 = inlined_call_operand.hbm [shape: bf16[32,384], index: 4, kind: input, shape index: {}]   ;;  %s3759_s5 = inlined_call_operand.hbm [shape: bf16[288,384], index: 5, kind: input, shape index: {}]   ;;  %s3760_s6 = inlined_call_operand.hbm [shape: f32[16,200], index: 6, kind: output, shape index: {0}]   ;;  %s3761_s7 = inlined_call_operand.hbm [shape: f32[16,300], index: 7, kind: output, shape index: {1}]  }
   0x1   :  { %3762 = sst [smem:[#allocation19_spill]] %s3755_s1 }
   0x2   :  { %3763 = sst [smem:[#allocation20_spill]] %s3756_s2 }
   0x3   :  { %13 = vsyncpa [#allocation3], 0 }
   0x4   :  { %14 = vsyncpa [#allocation6], 0 }
   0x5   :  { %15 = vsyncpa [#allocation9], 0 }
   0x6   :  { %16 = vsyncpa [#allocation4], 0 }
   0x7   :  { %18 = vsyncpa [#allocation4 + $0x1], 0 }
   0x8   :  { %19 = vsyncpa [#allocation12], 0 }
   0x9   :  { %21 = vsyncpa [#allocation12 + $0x1], 0  ;;  %s3441_s24 = smov 0   ;;  %s3443_s25 = smov 0  }
   0xa   :  { %s3445_s26 = smov 0   ;;  %s3447_s27 = smov 0  }
   0xb LB: > { %s3462_s28 = sadd.s32 4294967295, %s3386_s27   ;;  %s2199_s29 = sadd.s32 4294967294, %s3386_s27   ;;  %s3386_s27 = sphi %s3447_s27, %s3787_s27   ;;  %s3382_s26 = sphi %s3445_s26, %s3786_s26   ;;  %s3378_s25 = sphi %s3443_s25, %s3785_s25   ;;  %s3374_s24 = sphi %s3441_s24, %s3784_s24  }
   0xc   : > { %s3466_s30 = sadd.s32 1, %s3386_s27   ;;  %s165_s8 = sadd.s32 1, %s3382_s26 }
   0xd   : > { %s162_s9 = ssub.s32 %s3386_s27, %s3466_s30  ;;  %p175_p0 = scmp.ne.s32.totalorder %s3382_s26, %s3378_s25 }
   0xe   : > { %p163_p1 = scmp.eq.s32.totalorder %s162_s9, 0  ;;  %p176_p2 = scmp.eq.s32.totalorder %s3462_s28, 1 }
   0xf   : > { %p181_p3 = scmp.ne.s32.totalorder %s3378_s25, %s3374_s24  ;;  %p182_p4 = scmp.eq.s32.totalorder %s2199_s29, 1 }
  0x10   : > { %s3477_s10 = scalar_select %p163_p1, %s3382_s26, %s165_s8  }
  0x11   : > { %p3479_p5 = por %p176_p2, %p175_p0  ;;  %p3483_p6 = por %p182_p4, %p181_p3 }
  0x12   : > { %3764 = sst [smem:[#allocation18_spill]] %s3477_s10  ;;  %p2200_p7 = scmp.ge.s32.totalorder %s3386_s27, 1 }
  0x13   : > { %p215_p8 = scmp.lt.s32.totalorder %s3386_s27, 3  ;;  %p3092_p9 = scmp.eq.s32.totalorder %s3462_s28, 0 }
  0x14   : > { %s3768_s2 = sld [smem:[#allocation20_spill]]  ;;  %s3388_s21 = smov [#allocation5]  }
  0x15   : > { %p3490_p10 = pnand %p2200_p7, %p215_p8  ;;  %s3769_s1 = sld [smem:[#allocation19_spill]] }
  0x16   : > { %s242_s22 = sshll.u32 %s3388_s21, 4  ;;  %s3389_s23 = smov 192   ;;  %s243_s22 = int_to_ptr.vmem [resolvable:$true] %s242_s22 }
  0x17   : > { %p3072_p11 = pneg %p3490_p10  ;;  %s3390_s29 = smov 12  }
  0x18   : > { %s3391_s8 = smov [#allocation2]   ;;  %s257_s17 = sshll.u32 %s3758_s4, 4  ;;  %s258_s17 = int_to_ptr.hbm [resolvable:$true] %s257_s17 }
  0x19   : > { %p3504_p12 = pnand %p3092_p9, %p3072_p11  ;;  %s228_s9 = sshll.u32 %s3391_s8, 4  ;;  %s229_s9 = int_to_ptr.vmem [resolvable:$true] %s228_s9 }
  0x1a   : > { %s240_s16 = sshll.u32 %s3768_s2, 4  ;;  %s3392_s2 = smov [#allocation7]   ;;  %s241_s16 = int_to_ptr.hbm [resolvable:$true] %s240_s16 }
  0x1b   : > { %s226_s19 = sshll.u32 %s3769_s1, 4  ;;  %s271_s1 = sshll.u32 %s3759_s5, 4  ;;  %s227_s19 = int_to_ptr.hbm [resolvable:$true] %s226_s19  ;;  %s272_s1 = int_to_ptr.hbm [resolvable:$true] %s271_s1 }
  0x1c   : > { %3078 = dma.hbm_to_vmem [thread:$0]  (!%p3504_p12), %s241_s16, 6144, %s243_s22, [#allocation6], %s3389_s23, %s3389_s23, %s3390_s29  }
  0x1d   : > { %3075 = dma.hbm_to_vmem [thread:$0]  (!%p3504_p12), %s227_s19, 6144, %s229_s9, [#allocation3], %s3389_s23, %s3389_s23, %s3390_s29  }
  0x1e   : > { %s259_s10 = sshll.u32 %s3392_s2, 4  ;;  %s3393_s16 = smov [#allocation8]   ;;  %s260_s10 = int_to_ptr.vmem [resolvable:$true] %s259_s10 }
  0x1f   : > { %3081 = dma.hbm_to_vmem [thread:$0]  (!%p3504_p12), %s258_s17, 768, %s260_s10, [#allocation6], %s3389_s23, %s3389_s23, %s3390_s29  }
  0x20   : > { %s273_s22 = sshll.u32 %s3393_s16, 4  ;;  %296 = sbr.rel (%p3490_p10) target bundleno = 415 (0x19f), region = 44  ;;  %s274_s22 = int_to_ptr.vmem [resolvable:$true] %s273_s22 }
  0x21   : > { %3084 = dma.hbm_to_vmem [thread:$0]  (!%p3504_p12), %s272_s1, 6912, %s274_s22, [#allocation9], %s3389_s23, %s3389_s23, %s3390_s29  }
  0x25   : > { %3353 = dma.done.wait (%p3092_p9), [#allocation3], 6144  }
  0x26   : > { %3355 = vsyncadd (%p3092_p9), [#allocation3], 4294961152 }
  0x27   : > { %3357 = dma.done.wait (%p3092_p9), [#allocation6], 6912  }
  0x28   : > { %3359 = vsyncadd (%p3092_p9), [#allocation6], 4294960384 }
  0x29   : > { %3361 = dma.done.wait (%p3092_p9), [#allocation9], 6912  }
  0x2a   : > { %3363 = vsyncadd (%p3092_p9), [#allocation9], 4294960384  ;;  %p348_p13 = scmp.lt.s32.totalorder %s3462_s28, 1  ;;  %v3394_v0 = vmov 0   ;;  %v3395_v1 = vmov 3   ;;  %v3396_v38 = vmov 1  }
  0x2b   : > { %3146 = vset.pattern.permute.xlu0 %v3394_v0  ;;  %3148 = vset.pattern.permute.xlu1 %v3395_v1  ;;  %v2245_v3 = vld [vmem:[#allocation2 + $0xac] sm:$0xf]  ;;  %v2916_v4 = vld [vmem:[#allocation2 + $0xb4] sm:$0xf0]  ;;  %v2313_v6 = vld [vmem:[#allocation2 + $0xa8] sm:$0xf] }
  0x2c   : > { %s349_s1 = scalar_select %p348_p13, %s3462_s28, 1  ;;  %v2246_v5 = vor.u32 %v2916_v4, %v2245_v3  ;;  %v2900_v7 = vld [vmem:[#allocation2 + $0xb0] sm:$0xf0]  ;;  %v2345_v8 = vld [vmem:[#allocation2 + $0x168] sm:$0xf]  ;;  %v3397_v39 = vmov 4  }
  0x2d   : > { %v2314_v9 = vor.u32 %v2900_v7, %v2313_v6  ;;  %v2908_v10 = vld [vmem:[#allocation2 + $0x170] sm:$0xf0]  ;;  %v2277_v11 = vld [vmem:[#allocation2 + $0x16c] sm:$0xf]  ;;  %v2924_v12 = vld [vmem:[#allocation2 + $0x174] sm:$0xf0] }
  0x2e   : > { %s2212_s2 = sshll.u32 %s349_s1, 3  ;;  %528 = vmatpush.bf16.msra.mxu0 %v2246_v5  ;;  %v2346_v13 = vor.u32 %v2908_v10, %v2345_v8  ;;  %v2278_v14 = vor.u32 %v2924_v12, %v2277_v11  ;;  %v2241_v15 = vld [vmem:[#allocation2 + $0x94] sm:$0xf]  ;;  %v2915_v16 = vld [vmem:[#allocation2 + $0x9c] sm:$0xf0]  ;;  %vm1371_vm9 = vcmask 261120  }
  0x2f   : > { %s3541_s19 = scalar_lea.vmem %s3754_s0, %s2212_s2  ;;  %v2309_v17 = vld [vmem:[#allocation2 + $0x90] sm:$0xf]  ;;  %650 = vmatpush.bf16.msra.mxu2 %v2314_v9  ;;  %v2242_v18 = vor.u32 %v2915_v16, %v2241_v15  ;;  %v2899_v19 = vld [vmem:[#allocation2 + $0x98] sm:$0xf0]  ;;  %v2273_v23 = vld [vmem:[#allocation2 + $0x154] sm:$0xf] }
  0x30   : > { %v355_v2 = vld [vmem:[%s3541_s19] sm:$0xff]  ;;  %v2341_v20 = vld [vmem:[#allocation2 + $0x150] sm:$0xf]  ;;  %v2907_v21 = vld [vmem:[#allocation2 + $0x158] sm:$0xf0]  ;;  %663 = vmatpush.bf16.msra.mxu3 %v2346_v13  ;;  %541 = vmatpush.bf16.msra.mxu1 %v2278_v14  ;;  %v2310_v22 = vor.u32 %v2899_v19, %v2309_v17  ;;  %s3659_s29 = sand.u32 1, %s3378_s25  }
  0x31   : > { %358 = vperm.xlu0 %3146, %v355_v2   ;;  %1345 = vperm.xlu1 %3148, %v355_v2   ;;  %v2923_v24 = vld [vmem:[#allocation2 + $0x15c] sm:$0xf0]  ;;  %v2237_v25 = vld [vmem:[#allocation2 + $0x7c] sm:$0xf]  ;;  %v2914_v26 = vld [vmem:[#allocation2 + $0x84] sm:$0xf0]  ;;  %v2342_v29 = vor.u32 %v2907_v21, %v2341_v20 }
  0x32   : > { %v2305_v27 = vld [vmem:[#allocation2 + $0x78] sm:$0xf]  ;;  %v2898_v28 = vld [vmem:[#allocation2 + $0x80] sm:$0xf0]  ;;  %529 = vmatpush.bf16.msra.mxu0 %v2242_v18  ;;  %v2274_v30 = vor.u32 %v2923_v24, %v2273_v23  ;;  %v2238_v33 = vor.u32 %v2914_v26, %v2237_v25  ;;  %v2269_v35 = vld [vmem:[#allocation2 + $0x13c] sm:$0xf] }
  0x33   : > { %v2337_v31 = vld [vmem:[#allocation2 + $0x138] sm:$0xf]  ;;  %v2906_v32 = vld [vmem:[#allocation2 + $0x140] sm:$0xf0]  ;;  %651 = vmatpush.bf16.msra.mxu2 %v2310_v22  ;;  %v2306_v34 = vor.u32 %v2898_v28, %v2305_v27  ;;  %v2922_v36 = vld [vmem:[#allocation2 + $0x144] sm:$0xf0] }
  0x34   : > { %v2233_v37 = vld [vmem:[#allocation2 + $0x64] sm:$0xf]  ;;  %v2913_v40 = vld [vmem:[#allocation2 + $0x6c] sm:$0xf0]  ;;  %v2301_v41 = vld [vmem:[#allocation2 + $0x60] sm:$0xf]  ;;  %664 = vmatpush.bf16.msra.mxu3 %v2342_v29  ;;  %542 = vmatpush.bf16.msra.mxu1 %v2274_v30  ;;  %v2338_v43 = vor.u32 %v2906_v32, %v2337_v31  ;;  %v2270_v44 = vor.u32 %v2922_v36, %v2269_v35 }
  0x35   : > { %v2897_v42 = vld [vmem:[#allocation2 + $0x68] sm:$0xf0]  ;;  %v2333_v45 = vld [vmem:[#allocation2 + $0x120] sm:$0xf]  ;;  %v2234_v47 = vor.u32 %v2913_v40, %v2233_v37  ;;  %v2265_v49 = vld [vmem:[#allocation2 + $0x124] sm:$0xf] }
  0x36   : > { %v2905_v46 = vld [vmem:[#allocation2 + $0x128] sm:$0xf0]  ;;  %530 = vmatpush.bf16.msra.mxu0 %v2238_v33  ;;  %v2302_v48 = vor.u32 %v2897_v42, %v2301_v41  ;;  %v2921_v50 = vld [vmem:[#allocation2 + $0x12c] sm:$0xf0]  ;;  %v2912_v52 = vld [vmem:[#allocation2 + $0x54] sm:$0xf0] }
  0x37   : > { %652 = vmatpush.bf16.msra.mxu2 %v2306_v34  ;;  %v2229_v51 = vld [vmem:[#allocation2 + $0x4c] sm:$0xf]  ;;  %v2297_v53 = vld [vmem:[#allocation2 + $0x48] sm:$0xf]  ;;  %v2896_v54 = vld [vmem:[#allocation2 + $0x50] sm:$0xf0]  ;;  %v2334_v55 = vor.u32 %v2905_v46, %v2333_v45  ;;  %v2266_v56 = vor.u32 %v2921_v50, %v2265_v49 }
  0x38   : > { %665 = vmatpush.bf16.msra.mxu3 %v2338_v43  ;;  %543 = vmatpush.bf16.msra.mxu1 %v2270_v44  ;;  %v2329_v57 = vld [vmem:[#allocation2 + $0x108] sm:$0xf]  ;;  %v2904_v58 = vld [vmem:[#allocation2 + $0x110] sm:$0xf0]  ;;  %v2230_v59 = vor.u32 %v2912_v52, %v2229_v51  ;;  %v2298_v60 = vor.u32 %v2896_v54, %v2297_v53  ;;  %v2261_v61 = vld [vmem:[#allocation2 + $0x10c] sm:$0xf] }
  0x39   : > { %3147 = vset.pattern.permute.xlu0 %v3396_v38  ;;  %3149 = vset.pattern.permute.xlu1 %v3397_v39  ;;  %v2920_v62 = vld [vmem:[#allocation2 + $0x114] sm:$0xf0]  ;;  %v2225_v63 = vld [vmem:[#allocation2 + $0x34] sm:$0xf]  ;;  %v2911_v0 = vld [vmem:[#allocation2 + $0x3c] sm:$0xf0]  ;;  %v2330_v3 = vor.u32 %v2904_v58, %v2329_v57 }
  0x3a   : > { %833 = vperm.xlu0 %3147, %v355_v2   ;;  %1449 = vperm.xlu1 %3149, %v355_v2   ;;  %v2293_v1 = vld [vmem:[#allocation2 + $0x30] sm:$0xf]  ;;  %v2895_v2 = vld [vmem:[#allocation2 + $0x38] sm:$0xf0]  ;;  %v2262_v4 = vor.u32 %v2920_v62, %v2261_v61  ;;  %v2226_v7 = vor.u32 %v2911_v0, %v2225_v63  ;;  %v2257_v9 = vld [vmem:[#allocation2 + $0xf4] sm:$0xf] }
  0x3b   : > { %531 = vmatpush.bf16.msra.mxu0 %v2234_v47  ;;  %653 = vmatpush.bf16.msra.mxu2 %v2302_v48  ;;  %v2325_v5 = vld [vmem:[#allocation2 + $0xf0] sm:$0xf]  ;;  %v2903_v6 = vld [vmem:[#allocation2 + $0xf8] sm:$0xf0]  ;;  %v2294_v8 = vor.u32 %v2895_v2, %v2293_v1  ;;  %v2919_v10 = vld [vmem:[#allocation2 + $0xfc] sm:$0xf0] }
  0x3c   : > { %666 = vmatpush.bf16.msra.mxu3 %v2334_v55  ;;  %544 = vmatpush.bf16.msra.mxu1 %v2266_v56  ;;  %v2221_v11 = vld [vmem:[#allocation2 + $0x1c] sm:$0xf]  ;;  %v2910_v12 = vld [vmem:[#allocation2 + $0x24] sm:$0xf0]  ;;  %v2289_v13 = vld [vmem:[#allocation2 + $0x18] sm:$0xf]  ;;  %v2326_v15 = vor.u32 %v2903_v6, %v2325_v5  ;;  %v2258_v16 = vor.u32 %v2919_v10, %v2257_v9 }
  0x3d   : > { %v2894_v14 = vld [vmem:[#allocation2 + $0x20] sm:$0xf0]  ;;  %v2321_v17 = vld [vmem:[#allocation2 + $0xd8] sm:$0xf]  ;;  %v2253_v19 = vld [vmem:[#allocation2 + $0xdc] sm:$0xf]  ;;  %v2222_v20 = vor.u32 %v2910_v12, %v2221_v11 }
  0x3e   : > { %v2902_v18 = vld [vmem:[#allocation2 + $0xe0] sm:$0xf0]  ;;  %v2290_v21 = vor.u32 %v2894_v14, %v2289_v13  ;;  %v2918_v22 = vld [vmem:[#allocation2 + $0xe4] sm:$0xf0]  ;;  %v2909_v24 = vld [vmem:[#allocation2 + $0xc] sm:$0xf0] }
  0x3f   : > { %532 = vmatpush.bf16.msra.mxu0 %v2230_v59  ;;  %654 = vmatpush.bf16.msra.mxu2 %v2298_v60  ;;  %v2217_v23 = vld [vmem:[#allocation2 + $0x4] sm:$0xf]  ;;  %v2285_v25 = vld [vmem:[#allocation2] sm:$0xf]  ;;  %v2893_v26 = vld [vmem:[#allocation2 + $0x8] sm:$0xf0]  ;;  %v2322_v31 = vor.u32 %v2902_v18, %v2321_v17  ;;  %v2254_v32 = vor.u32 %v2918_v22, %v2253_v19 }
  0x40   : > { %667 = vmatpush.bf16.msra.mxu3 %v2330_v3  ;;  %545 = vmatpush.bf16.msra.mxu1 %v2262_v4  ;;  %v2381_v27 = vld [vmem:[#allocation2 + $0xb0] sm:$0xf]  ;;  %v2932_v28 = vld [vmem:[#allocation2 + $0xb8] sm:$0xf0]  ;;  %v2451_v29 = vld [vmem:[#allocation5 + $0xac] sm:$0xf]  ;;  %v2218_v36 = vor.u32 %v2909_v24, %v2217_v23  ;;  %v2286_v37 = vor.u32 %v2893_v26, %v2285_v25 }
  0x41   : > { %v2964_v30 = vld [vmem:[#allocation5 + $0xb4] sm:$0xf0]  ;;  %v2317_v33 = vld [vmem:[#allocation2 + $0xc0] sm:$0xf]  ;;  %v2901_v34 = vld [vmem:[#allocation2 + $0xc8] sm:$0xf0]  ;;  %v2382_v41 = vor.u32 %v2932_v28, %v2381_v27 }
  0x42   : > { %3151 = vset.pattern.permute.xlu0 %v3397_v39  ;;  %v2249_v35 = vld [vmem:[#allocation2 + $0xc4] sm:$0xf]  ;;  %v2917_v38 = vld [vmem:[#allocation2 + $0xcc] sm:$0xf0]  ;;  %v2483_v39 = vld [vmem:[#allocation5 + $0x16c] sm:$0xf]  ;;  %v2452_v42 = vor.u32 %v2964_v30, %v2451_v29  ;;  %v2318_v49 = vor.u32 %v2901_v34, %v2317_v33 }
  0x43   : > { %533 = vmatpush.bf16.msra.mxu0 %v2226_v7  ;;  %655 = vmatpush.bf16.msra.mxu2 %v2294_v8  ;;  %v2972_v40 = vld [vmem:[#allocation5 + $0x174] sm:$0xf0]  ;;  %v2413_v43 = vld [vmem:[#allocation2 + $0x170] sm:$0xf]  ;;  %v2940_v44 = vld [vmem:[#allocation2 + $0x178] sm:$0xf0]  ;;  %v2250_v50 = vor.u32 %v2917_v38, %v2249_v35 }
  0x44   : > { %668 = vmatpush.bf16.msra.mxu3 %v2326_v15  ;;  %546 = vmatpush.bf16.msra.mxu1 %v2258_v16  ;;  %v2377_v45 = vld [vmem:[#allocation2 + $0x98] sm:$0xf]  ;;  %v2931_v46 = vld [vmem:[#allocation2 + $0xa0] sm:$0xf0]  ;;  %v2447_v47 = vld [vmem:[#allocation5 + $0x94] sm:$0xf]  ;;  %v2484_v51 = vor.u32 %v2972_v40, %v2483_v39  ;;  %v2414_v52 = vor.u32 %v2940_v44, %v2413_v43 }
  0x45   : > { %v2963_v48 = vld [vmem:[#allocation5 + $0x9c] sm:$0xf0]  ;;  %v2479_v53 = vld [vmem:[#allocation5 + $0x154] sm:$0xf]  ;;  %v2378_v55 = vor.u32 %v2931_v46, %v2377_v45  ;;  %v2409_v57 = vld [vmem:[#allocation2 + $0x158] sm:$0xf] }
  0x46   : > { %v2971_v54 = vld [vmem:[#allocation5 + $0x15c] sm:$0xf0]  ;;  %v2448_v56 = vor.u32 %v2963_v48, %v2447_v47  ;;  %v2939_v58 = vld [vmem:[#allocation2 + $0x160] sm:$0xf0]  ;;  %v2930_v60 = vld [vmem:[#allocation2 + $0x88] sm:$0xf0] }
  0x47   : > { %534 = vmatpush.bf16.msra.mxu0 %v2222_v20  ;;  %656 = vmatpush.bf16.msra.mxu2 %v2290_v21  ;;  %v2373_v59 = vld [vmem:[#allocation2 + $0x80] sm:$0xf]  ;;  %v2443_v61 = vld [vmem:[#allocation5 + $0x7c] sm:$0xf]  ;;  %v2962_v62 = vld [vmem:[#allocation5 + $0x84] sm:$0xf0]  ;;  %v2480_v63 = vor.u32 %v2971_v54, %v2479_v53  ;;  %v2410_v0 = vor.u32 %v2939_v58, %v2409_v57 }
  0x48   : > { %669 = vmatpush.bf16.msra.mxu3 %v2322_v31  ;;  %547 = vmatpush.bf16.msra.mxu1 %v2254_v32  ;;  %v2475_v1 = vld [vmem:[#allocation5 + $0x13c] sm:$0xf]  ;;  %v2970_v2 = vld [vmem:[#allocation5 + $0x144] sm:$0xf0]  ;;  %v2374_v3 = vor.u32 %v2930_v60, %v2373_v59  ;;  %v2444_v4 = vor.u32 %v2962_v62, %v2443_v61  ;;  %v2405_v5 = vld [vmem:[#allocation2 + $0x140] sm:$0xf] }
  0x49   : > { %v2938_v6 = vld [vmem:[#allocation2 + $0x148] sm:$0xf0]  ;;  %v2369_v7 = vld [vmem:[#allocation2 + $0x68] sm:$0xf]  ;;  %v2929_v8 = vld [vmem:[#allocation2 + $0x70] sm:$0xf0]  ;;  %v2476_v15 = vor.u32 %v2970_v2, %v2475_v1 }
  0x4a   : > { %v2439_v9 = vld [vmem:[#allocation5 + $0x64] sm:$0xf]  ;;  %v2961_v10 = vld [vmem:[#allocation5 + $0x6c] sm:$0xf0]  ;;  %v2401_v13 = vld [vmem:[#allocation2 + $0x128] sm:$0xf]  ;;  %v2406_v16 = vor.u32 %v2938_v6, %v2405_v5  ;;  %v2370_v20 = vor.u32 %v2929_v8, %v2369_v7  ;;  %v353_v5 = vlaneseq }
  0x4b   : > { %535 = vmatpush.bf16.msra.mxu0 %v2218_v36  ;;  %657 = vmatpush.bf16.msra.mxu2 %v2286_v37  ;;  %v2471_v11 = vld [vmem:[#allocation5 + $0x124] sm:$0xf]  ;;  %v2969_v12 = vld [vmem:[#allocation5 + $0x12c] sm:$0xf0]  ;;  %v2937_v14 = vld [vmem:[#allocation2 + $0x130] sm:$0xf0]  ;;  %v2440_v21 = vor.u32 %v2961_v10, %v2439_v9 }
  0x4c   : > { %670 = vmatpush.bf16.msra.mxu3 %v2318_v49  ;;  %548 = vmatpush.bf16.msra.mxu1 %v2250_v50  ;;  %v2365_v17 = vld [vmem:[#allocation2 + $0x50] sm:$0xf]  ;;  %v2928_v18 = vld [vmem:[#allocation2 + $0x58] sm:$0xf0]  ;;  %v2435_v19 = vld [vmem:[#allocation5 + $0x4c] sm:$0xf]  ;;  %v2472_v23 = vor.u32 %v2969_v12, %v2471_v11  ;;  %v2402_v24 = vor.u32 %v2937_v14, %v2401_v13 }
  0x4d   : > { %v2960_v22 = vld [vmem:[#allocation5 + $0x54] sm:$0xf0]  ;;  %v2467_v25 = vld [vmem:[#allocation5 + $0x10c] sm:$0xf]  ;;  %v2366_v27 = vor.u32 %v2928_v18, %v2365_v17  ;;  %v2397_v29 = vld [vmem:[#allocation2 + $0x110] sm:$0xf] }
  0x4e   : > { %v2968_v26 = vld [vmem:[#allocation5 + $0x114] sm:$0xf0]  ;;  %v2436_v28 = vor.u32 %v2960_v22, %v2435_v19  ;;  %v2936_v30 = vld [vmem:[#allocation2 + $0x118] sm:$0xf0]  ;;  %v2927_v32 = vld [vmem:[#allocation2 + $0x40] sm:$0xf0] }
  0x4f   : > { %804 = vmatpush.bf16.msrb.mxu0 %v2382_v41  ;;  %1003 = vmatpush.bf16.msrb.mxu2 %v2452_v42  ;;  %v2361_v31 = vld [vmem:[#allocation2 + $0x38] sm:$0xf]  ;;  %v2431_v33 = vld [vmem:[#allocation5 + $0x34] sm:$0xf]  ;;  %v2959_v34 = vld [vmem:[#allocation5 + $0x3c] sm:$0xf0]  ;;  %v2468_v35 = vor.u32 %v2968_v26, %v2467_v25  ;;  %v2398_v36 = vor.u32 %v2936_v30, %v2397_v29 }
  0x50   : > { %1016 = vmatpush.bf16.msrb.mxu3 %v2484_v51  ;;  %817 = vmatpush.bf16.msrb.mxu1 %v2414_v52  ;;  %v2463_v37 = vld [vmem:[#allocation5 + $0xf4] sm:$0xf]  ;;  %v2967_v38 = vld [vmem:[#allocation5 + $0xfc] sm:$0xf0]  ;;  %v2362_v39 = vor.u32 %v2927_v32, %v2361_v31  ;;  %v2432_v40 = vor.u32 %v2959_v34, %v2431_v33  ;;  %v2393_v41 = vld [vmem:[#allocation2 + $0xf8] sm:$0xf] }
  0x51   : > { %v2935_v42 = vld [vmem:[#allocation2 + $0x100] sm:$0xf0]  ;;  %v2357_v43 = vld [vmem:[#allocation2 + $0x20] sm:$0xf]  ;;  %v2926_v44 = vld [vmem:[#allocation2 + $0x28] sm:$0xf0]  ;;  %v2464_v47 = vor.u32 %v2967_v38, %v2463_v37 }
  0x52   : > { %v2427_v45 = vld [vmem:[#allocation5 + $0x1c] sm:$0xf]  ;;  %v2958_v46 = vld [vmem:[#allocation5 + $0x24] sm:$0xf0]  ;;  %v2394_v48 = vor.u32 %v2935_v42, %v2393_v41  ;;  %v2358_v50 = vor.u32 %v2926_v44, %v2357_v43  ;;  %v2389_v53 = vld [vmem:[#allocation2 + $0xe0] sm:$0xf] }
  0x53   : > { %805 = vmatpush.bf16.msrb.mxu0 %v2378_v55  ;;  %1004 = vmatpush.bf16.msrb.mxu2 %v2448_v56  ;;  %v2459_v49 = vld [vmem:[#allocation5 + $0xdc] sm:$0xf]  ;;  %v2428_v51 = vor.u32 %v2958_v46, %v2427_v45  ;;  %v2966_v52 = vld [vmem:[#allocation5 + $0xe4] sm:$0xf0]  ;;  %v2934_v54 = vld [vmem:[#allocation2 + $0xe8] sm:$0xf0] }
  0x54   : > { %1017 = vmatpush.bf16.msrb.mxu3 %v2480_v63  ;;  %818 = vmatpush.bf16.msrb.mxu1 %v2410_v0  ;;  %v2460_v55 = vor.u32 %v2966_v52, %v2459_v49  ;;  %v2390_v56 = vor.u32 %v2934_v54, %v2389_v53  ;;  %v2353_v57 = vld [vmem:[#allocation2 + $0x8] sm:$0xf]  ;;  %v2925_v58 = vld [vmem:[#allocation2 + $0x10] sm:$0xf0]  ;;  %v2423_v59 = vld [vmem:[#allocation5 + $0x4] sm:$0xf] }
  0x55   : > { %v2354_v60 = vor.u32 %v2925_v58, %v2353_v57  ;;  %v2957_v61 = vld [vmem:[#allocation5 + $0xc] sm:$0xf0]  ;;  %v2455_v62 = vld [vmem:[#allocation5 + $0xc4] sm:$0xf]  ;;  %v2385_v2 = vld [vmem:[#allocation2 + $0xc8] sm:$0xf] }
  0x56   : > { %v2965_v63 = vld [vmem:[#allocation5 + $0xcc] sm:$0xf0]  ;;  %v2424_v0 = vor.u32 %v2957_v61, %v2423_v59  ;;  %v3544_v6 = vand.u32 127, %v353_v5  ;;  %v2519_v8 = vld [vmem:[#allocation5 + $0xa8] sm:$0xf]  ;;  %s3049_s8 = sshll.u32 %s3462_s28, 4 }
  0x57   : > { %806 = vmatpush.bf16.msrb.mxu0 %v2374_v3  ;;  %1005 = vmatpush.bf16.msrb.mxu2 %v2444_v4  ;;  %v2456_v1 = vor.u32 %v2965_v63, %v2455_v62  ;;  %v2933_v3 = vld [vmem:[#allocation2 + $0xd0] sm:$0xf0]  ;;  %v2587_v10 = vld [vmem:[#allocation5 + $0xb0] sm:$0xf]  ;;  %v2980_v11 = vld [vmem:[#allocation5 + $0xb8] sm:$0xf0]  ;;  %s2046_s21 = scalar_lea.hbm %s3760_s6, %s3049_s8 }
  0x58   : > { %1018 = vmatpush.bf16.msrb.mxu3 %v2476_v15  ;;  %819 = vmatpush.bf16.msrb.mxu1 %v2406_v16  ;;  %v2386_v4 = vor.u32 %v2933_v3, %v2385_v2  ;;  %v3547_v7 = vadd.s32 128, %v3544_v6  ;;  %v2948_v9 = vld [vmem:[#allocation5 + $0xb0] sm:$0xf0]  ;;  %v2619_v12 = vld [vmem:[#allocation5 + $0x170] sm:$0xf]  ;;  %v2588_v19 = vor.u32 %v2980_v11, %v2587_v10  ;;  %s2211_s15 = sshll.u32 %s3659_s29, 4 }
  0x59   : > { %v2988_v13 = vld [vmem:[#allocation5 + $0x178] sm:$0xf0]  ;;  %v2551_v14 = vld [vmem:[#allocation5 + $0x168] sm:$0xf]  ;;  %v2956_v15 = vld [vmem:[#allocation5 + $0x170] sm:$0xf0]  ;;  %v2520_v18 = vor.u32 %v2948_v9, %v2519_v8 }
  0x5a   : > { %v2515_v17 = vld [vmem:[#allocation5 + $0x90] sm:$0xf]  ;;  %v2979_v22 = vld [vmem:[#allocation5 + $0xa0] sm:$0xf0]  ;;  %v2552_v25 = vor.u32 %v2956_v15, %v2551_v14  ;;  %v2615_v26 = vld [vmem:[#allocation5 + $0x158] sm:$0xf] }
  0x5b   : > { %807 = vmatpush.bf16.msrb.mxu0 %v2370_v20  ;;  %1006 = vmatpush.bf16.msrb.mxu2 %v2440_v21  ;;  %v2947_v20 = vld [vmem:[#allocation5 + $0x98] sm:$0xf0]  ;;  %v2583_v21 = vld [vmem:[#allocation5 + $0x98] sm:$0xf]  ;;  %v2547_v30 = vld [vmem:[#allocation5 + $0x150] sm:$0xf] }
  0x5c   : > { %1019 = vmatpush.bf16.msrb.mxu3 %v2472_v23  ;;  %820 = vmatpush.bf16.msrb.mxu1 %v2402_v24  ;;  %v2620_v24 = vor.u32 %v2988_v13, %v2619_v12  ;;  %v2955_v31 = vld [vmem:[#allocation5 + $0x158] sm:$0xf0]  ;;  %v2516_v32 = vor.u32 %v2947_v20, %v2515_v17  ;;  %v2584_v33 = vor.u32 %v2979_v22, %v2583_v21  ;;  %v2511_v34 = vld [vmem:[#allocation5 + $0x78] sm:$0xf]  ;;  %v2579_v38 = vld [vmem:[#allocation5 + $0x80] sm:$0xf] }
  0x5d   : > { %v2548_v37 = vor.u32 %v2955_v31, %v2547_v30  ;;  %v2986_v41 = vld [vmem:[#allocation5 + $0x148] sm:$0xf0]  ;;  %v2543_v42 = vld [vmem:[#allocation5 + $0x138] sm:$0xf]  ;;  %v2954_v43 = vld [vmem:[#allocation5 + $0x140] sm:$0xf0] }
  0x5e   : > { %v2507_v46 = vld [vmem:[#allocation5 + $0x60] sm:$0xf]  ;;  %v2544_v49 = vor.u32 %v2954_v43, %v2543_v42  ;;  %v2607_v52 = vld [vmem:[#allocation5 + $0x128] sm:$0xf]  ;;  %v2985_v54 = vld [vmem:[#allocation5 + $0x130] sm:$0xf0] }
  0x5f   : > { %808 = vmatpush.bf16.msrb.mxu0 %v2366_v27  ;;  %1007 = vmatpush.bf16.msrb.mxu2 %v2436_v28  ;;  %v2987_v27 = vld [vmem:[#allocation5 + $0x160] sm:$0xf0]  ;;  %v3398_v28 = vmov 1.0|1.0   ;;  %v2503_v59 = vld [vmem:[#allocation5 + $0x48] sm:$0xf]  ;;  %v2608_v61 = vor.u32 %v2985_v54, %v2607_v52 }
  0x60   : > { %1020 = vmatpush.bf16.msrb.mxu3 %v2468_v35  ;;  %821 = vmatpush.bf16.msrb.mxu1 %v2398_v36  ;;  %v2946_v35 = vld [vmem:[#allocation5 + $0x80] sm:$0xf0]  ;;  %v2616_v36 = vor.u32 %v2987_v27, %v2615_v26  ;;  %v2571_v63 = vld [vmem:[#allocation5 + $0x50] sm:$0xf]  ;;  %v2984_v2 = vld [vmem:[#allocation5 + $0x118] sm:$0xf0] }
  0x61   : > { %v2512_v44 = vor.u32 %v2946_v35, %v2511_v34  ;;  %v2535_v3 = vld [vmem:[#allocation5 + $0x108] sm:$0xf]  ;;  %v2499_v11 = vld [vmem:[#allocation5 + $0x30] sm:$0xf]  ;;  %v2943_v12 = vld [vmem:[#allocation5 + $0x38] sm:$0xf0] }
  0x62   : > { %v2567_v15 = vld [vmem:[#allocation5 + $0x38] sm:$0xf]  ;;  %v2951_v20 = vld [vmem:[#allocation5 + $0xf8] sm:$0xf0]  ;;  %v2500_v21 = vor.u32 %v2943_v12, %v2499_v11  ;;  %v2563_v27 = vld [vmem:[#allocation5 + $0x20] sm:$0xf] }
  0x63   : > { %809 = vmatpush.bf16.msrb.mxu0 %v2362_v39  ;;  %1008 = vmatpush.bf16.msrb.mxu2 %v2432_v40  ;;  %v2978_v39 = vld [vmem:[#allocation5 + $0x88] sm:$0xf0]  ;;  %v2611_v40 = vld [vmem:[#allocation5 + $0x140] sm:$0xf]  ;;  %v2599_v17 = vld [vmem:[#allocation5 + $0xf8] sm:$0xf] }
  0x64   : > { %1021 = vmatpush.bf16.msrb.mxu3 %v2464_v47  ;;  %822 = vmatpush.bf16.msrb.mxu1 %v2394_v48  ;;  %v2580_v45 = vor.u32 %v2978_v39, %v2579_v38  ;;  %v2945_v47 = vld [vmem:[#allocation5 + $0x68] sm:$0xf0]  ;;  %v2612_v48 = vor.u32 %v2986_v41, %v2611_v40  ;;  %v2495_v23 = vld [vmem:[#allocation5 + $0x18] sm:$0xf]  ;;  %v2595_v31 = vld [vmem:[#allocation5 + $0xe0] sm:$0xf] }
  0x65   : > { %v2508_v57 = vor.u32 %v2945_v47, %v2507_v46  ;;  %v2974_v30 = vld [vmem:[#allocation5 + $0x28] sm:$0xf0]  ;;  %v2527_v29 = vld [vmem:[#allocation5 + $0xd8] sm:$0xf]  ;;  %v2559_v38 = vld [vmem:[#allocation5 + $0x8] sm:$0xf] }
  0x66   : > { %v2564_v35 = vor.u32 %v2974_v30, %v2563_v27  ;;  %v2973_v41 = vld [vmem:[#allocation5 + $0x10] sm:$0xf0]  ;;  %v2591_v42 = vld [vmem:[#allocation5 + $0xc8] sm:$0xf]  ;;  %v2632_v46 = vld [vmem:[#allocation7 + $0x1c] sm:$0xf] }
  0x67   : > { %810 = vmatpush.bf16.msrb.mxu0 %v2358_v50  ;;  %1009 = vmatpush.bf16.msrb.mxu2 %v2428_v51  ;;  %v2575_v50 = vld [vmem:[#allocation5 + $0x68] sm:$0xf]  ;;  %v2977_v51 = vld [vmem:[#allocation5 + $0x70] sm:$0xf0]  ;;  %v2686_v52 = vld [vmem:[#allocation8 + $0xac] sm:$0xf] }
  0x68   : > { %1022 = vmatpush.bf16.msrb.mxu3 %v2460_v55  ;;  %823 = vmatpush.bf16.msrb.mxu1 %v2390_v56  ;;  %v2539_v55 = vld [vmem:[#allocation5 + $0x120] sm:$0xf]  ;;  %v2953_v56 = vld [vmem:[#allocation5 + $0x128] sm:$0xf0]  ;;  %v2576_v58 = vor.u32 %v2977_v51, %v2575_v50  ;;  %v2981_v43 = vld [vmem:[#allocation5 + $0xd0] sm:$0xf0]  ;;  %v2560_v51 = vor.u32 %v2973_v41, %v2559_v38 }
  0x69   : > { %v2540_v62 = vor.u32 %v2953_v56, %v2539_v55  ;;  %v2992_v47 = vld [vmem:[#allocation7 + $0x24] sm:$0xf0]  ;;  %v2592_v54 = vor.u32 %v2981_v43, %v2591_v42  ;;  %v2628_v56 = vld [vmem:[#allocation7 + $0x4] sm:$0xf]  ;;  %v2710_v8 = vld [vmem:[#allocation8 + $0x13c] sm:$0xf] }
  0x6a   : > { %v2755_v38 = vld [vmem:[#allocation8 + $0x78] sm:$0xf]  ;;  %v2670_v43 = vld [vmem:[#allocation8 + $0x4c] sm:$0xf]  ;;  %s340_s1 = scalar_lea.vmem [#allocation10], %s2211_s15  ;;  %s2050_s10 = sshll.u32 %s2046_s21, 4  ;;  %s2051_s10 = int_to_ptr.hbm [resolvable:$true] %s2050_s10 }
  0x6b   : > { %811 = vmatpush.bf16.msrb.mxu0 %v2354_v60  ;;  %1010 = vmatpush.bf16.msrb.mxu2 %v2424_v0  ;;  %v2944_v60 = vld [vmem:[#allocation5 + $0x50] sm:$0xf0]  ;;  %v2976_v0 = vld [vmem:[#allocation5 + $0x58] sm:$0xf0]  ;;  %s2048_s2 = sshll.u32 %s340_s1, 4  ;;  %s2030_s8 = scalar_lea.sflag [#allocation4], %s3659_s29  ;;  %s2049_s2 = int_to_ptr.vmem [resolvable:$true] %s2048_s2 }
  0x6c   : > { %1023 = vmatpush.bf16.msrb.mxu3 %v2456_v1  ;;  %824 = vmatpush.bf16.msrb.mxu1 %v2386_v4  ;;  %v2603_v1 = vld [vmem:[#allocation5 + $0x110] sm:$0xf]  ;;  %v2952_v4 = vld [vmem:[#allocation5 + $0x110] sm:$0xf0]  ;;  %v2504_v9 = vor.u32 %v2944_v60, %v2503_v59  ;;  %v2572_v10 = vor.u32 %v2976_v0, %v2571_v63  ;;  %v2641_v60 = vld [vmem:[#allocation7 + $0x18] sm:$0xf] }
  0x6d   : > { %v2604_v13 = vor.u32 %v2984_v2, %v2603_v1  ;;  %v2536_v14 = vor.u32 %v2952_v4, %v2535_v3  ;;  %v2991_v59 = vld [vmem:[#allocation7 + $0xc] sm:$0xf0]  ;;  %v2646_v63 = vld [vmem:[#allocation7 + $0x8] sm:$0xf]  ;;  %v2993_v0 = vld [vmem:[#allocation7 + $0x10] sm:$0xf0] }
  0x6e   : > { %v2682_v1 = vld [vmem:[#allocation8 + $0x94] sm:$0xf]  ;;  %v3019_v2 = vld [vmem:[#allocation8 + $0x9c] sm:$0xf0]  ;;  %v2718_v3 = vld [vmem:[#allocation8 + $0x16c] sm:$0xf]  ;;  %v2629_v12 = vor.u32 %v2991_v59, %v2628_v56 }
  0x6f   : > { %v3028_v4 = vld [vmem:[#allocation8 + $0x174] sm:$0xf0]  ;;  %v3010_v56 = vld [vmem:[#allocation8 + $0x170] sm:$0xf0]  ;;  %v3015_v59 = vld [vmem:[#allocation8 + $0x3c] sm:$0xf0] }
  0x70   : > { %s3294_s9 = sshra.s32 %s2051_s10, 4  ;;  %s3300_s18 = scalar_lea.hbm %s3760_s6, 32  ;;  %s3295_s9 = int_to_ptr.hbm [resolvable:$true] %s3294_s9 }
  0x71   : > { %s3296_s14 = scalar_lea.hbm %s3295_s9, 16  ;;  %p3301_p3 = scmp.lt.s32.totalorder %s3295_s9, %s3760_s6 }
  0x72   : > { %p3297_p0 = scmp.ne.s32.totalorder %s3295_s9, %s3296_s14  ;;  %p3302_p4 = scmp.lt.s32.totalorder %s3300_s18, %s3296_s14 }
  0x74   : > { %p3298_p1 = pnand %p3297_p0, %p3479_p5  ;;  %p3303_p7 = por %p3302_p4, %p3301_p3 }
  0x76   : > { %p3299_p2 = pneg %p3298_p1 }
  0x78   : > { %p3304_p8 = pnand %p3303_p7, %p3299_p2 }
  0xa3   : > { %v359_v16 = vpop.permute.xlu0 %358 }
  0xa4   : > { %vm360_vm0 = vcmp.eq.s32.totalorder %v359_v16, %v3544_v6  ;;  %vm361_vm1 = vcmp.eq.s32.totalorder %v359_v16, %v3547_v7  ;;  %v2975_v16 = vld [vmem:[#allocation5 + $0x40] sm:$0xf0] }
  0xa5   : > { %vm3551_vm2 = vmpackc.low %vm360_vm0, %vm360_vm0  ;;  %v2568_v22 = vor.u32 %v2975_v16, %v2567_v15  ;;  %v2989_v15 = vld [vmem:[#allocation7 + $0x8] sm:$0xf0]  ;;  %v2683_v16 = vor.u32 %v3019_v2, %v2682_v1 }
  0xa6   : > { %2280 = vmatmul.msk.bf16.vlgmr.msra.gmra.mxu0 %vm3551_vm2, %v3398_v28  ;;  %vm3558_vm3 = vmpackc.low %vm361_vm1, %vm361_vm1  ;;  %2348 = vmatmul.msk.bf16.vlgmr.msra.gmra.mxu2 %vm3551_vm2, %v3398_v28 }
  0xa7   : > { %2282 = vmatmul.msk.bf16.vlgmr.msra.gmra.mxu1 %vm3558_vm3, %v3398_v28  ;;  %2350 = vmatmul.msk.bf16.vlgmr.msra.gmra.mxu3 %vm3558_vm3, %v3398_v28 }
  0xa8   : > { %1125 = vmatpush.bf16.msra.mxu0 %v2520_v18  ;;  %1279 = vmatpush.bf16.msra.mxu2 %v2588_v19  ;;  %v2983_v18 = vld [vmem:[#allocation5 + $0x100] sm:$0xf0]  ;;  %v2531_v19 = vld [vmem:[#allocation5 + $0xf0] sm:$0xf] }
  0xa9   : > { %1292 = vmatpush.bf16.msra.mxu3 %v2620_v24  ;;  %1138 = vmatpush.bf16.msra.mxu1 %v2552_v25  ;;  %v2942_v24 = vld [vmem:[#allocation5 + $0x20] sm:$0xf0]  ;;  %v2600_v25 = vor.u32 %v2983_v18, %v2599_v17  ;;  %v2532_v26 = vor.u32 %v2951_v20, %v2531_v19  ;;  %v2719_v17 = vor.u32 %v3028_v4, %v2718_v3  ;;  %v2678_v18 = vld [vmem:[#allocation8 + $0x7c] sm:$0xf]  ;;  %v3030_v20 = vld [vmem:[#allocation8 + $0x1a4] sm:$0xf0] }
  0xaa   : > { %v2496_v34 = vor.u32 %v2942_v24, %v2495_v23  ;;  %v2726_v19 = vld [vmem:[#allocation8 + $0x19c] sm:$0xf]  ;;  %v2714_v23 = vld [vmem:[#allocation8 + $0x154] sm:$0xf]  ;;  %v3027_v24 = vld [vmem:[#allocation8 + $0x15c] sm:$0xf0] }
  0xab   : > { %v2727_v30 = vor.u32 %v3030_v20, %v2726_v19  ;;  %v2715_v5 = vor.u32 %v3027_v24, %v2714_v23  ;;  %v2662_v3 = vld [vmem:[#allocation8 + $0x1c] sm:$0xf]  ;;  %v2791_v4 = vld [vmem:[#allocation8 + $0x150] sm:$0xf]  ;;  %v3008_v23 = vld [vmem:[#allocation8 + $0x140] sm:$0xf0] }
  0xac   : > { %1126 = vmatpush.bf16.msra.mxu0 %v2516_v32  ;;  %1280 = vmatpush.bf16.msra.mxu2 %v2584_v33  ;;  %v834_v53 = vpop.permute.xlu0 %833  ;;  %v2982_v32 = vld [vmem:[#allocation5 + $0xe8] sm:$0xf0]  ;;  %v2950_v33 = vld [vmem:[#allocation5 + $0xe0] sm:$0xf0] }
  0xad   : > { %1293 = vmatpush.bf16.msra.mxu3 %v2616_v36  ;;  %1139 = vmatpush.bf16.msra.mxu1 %v2548_v37  ;;  %vm835_vm4 = vcmp.eq.s32.totalorder %v834_v53, %v3544_v6  ;;  %vm836_vm5 = vcmp.eq.s32.totalorder %v834_v53, %v3547_v7  ;;  %v2491_v36 = vld [vmem:[#allocation5] sm:$0xf]  ;;  %v2941_v37 = vld [vmem:[#allocation5 + $0x8] sm:$0xf0]  ;;  %v2596_v39 = vor.u32 %v2982_v32, %v2595_v31  ;;  %v3020_v53 = vld [vmem:[#allocation8 + $0xb4] sm:$0xf0] }
  0xae   : > { %vm3573_vm6 = vmpackc.low %vm835_vm4, %vm835_vm4  ;;  %v2528_v40 = vor.u32 %v2950_v33, %v2527_v29  ;;  %v2492_v50 = vor.u32 %v2941_v37, %v2491_v36  ;;  %v2674_v32 = vld [vmem:[#allocation8 + $0x64] sm:$0xf]  ;;  %v1346_v29 = vpop.permute.xlu1 %1345  ;;  %v3017_v36 = vld [vmem:[#allocation8 + $0x6c] sm:$0xf0]  ;;  %vm2023_vm4 = vcmask 588800  }
  0xaf   : > { %vm3577_vm7 = vmpackc.low %vm836_vm5, %vm836_vm5  ;;  %v2722_v33 = vld [vmem:[#allocation8 + $0x184] sm:$0xf]  ;;  %v3026_v37 = vld [vmem:[#allocation8 + $0x144] sm:$0xf0]  ;;  %vm1347_vm8 = vcmp.eq.s32.totalorder %v1346_v29, %v3544_v6  ;;  %v2675_v41 = vor.u32 %v3017_v36, %v2674_v32 }
  0xb0   : > { %1127 = vmatpush.bf16.msra.mxu0 %v2512_v44  ;;  %1281 = vmatpush.bf16.msra.mxu2 %v2580_v45  ;;  %v2523_v44 = vld [vmem:[#allocation5 + $0xc0] sm:$0xf]  ;;  %v2949_v45 = vld [vmem:[#allocation5 + $0xc8] sm:$0xf0]  ;;  %v2711_v42 = vor.u32 %v3026_v37, %v2710_v8  ;;  %v3012_v32 = vld [vmem:[#allocation8 + $0x1a0] sm:$0xf0] }
  0xb1   : > { %1294 = vmatpush.bf16.msra.mxu3 %v2612_v48  ;;  %1140 = vmatpush.bf16.msra.mxu1 %v2544_v49  ;;  %v2650_v48 = vld [vmem:[#allocation7 + $0x20] sm:$0xf]  ;;  %v2994_v49 = vld [vmem:[#allocation7 + $0x28] sm:$0xf0]  ;;  %v2524_v55 = vor.u32 %v2949_v45, %v2523_v44  ;;  %v3016_v45 = vld [vmem:[#allocation8 + $0x54] sm:$0xf0] }
  0xb2   : > { %v3007_v36 = vld [vmem:[#allocation8 + $0x128] sm:$0xf0]  ;;  %v2690_v8 = vld [vmem:[#allocation8 + $0xc4] sm:$0xf] }
  0xb4   : > { %1128 = vmatpush.bf16.msra.mxu0 %v2508_v57  ;;  %1282 = vmatpush.bf16.msra.mxu2 %v2576_v58  ;;  %v2633_v57 = vor.u32 %v2992_v47, %v2632_v46  ;;  %v2651_v58 = vor.u32 %v2994_v49, %v2650_v48  ;;  %v2706_v46 = vld [vmem:[#allocation8 + $0x124] sm:$0xf]  ;;  %v3025_v47 = vld [vmem:[#allocation8 + $0x12c] sm:$0xf0]  ;;  %v3399_v48 = vmov 0.0  }
  0xb5   : > { %1295 = vmatpush.bf16.msra.mxu3 %v2608_v61  ;;  %1141 = vmatpush.bf16.msra.mxu1 %v2540_v62  ;;  %v2990_v61 = vld [vmem:[#allocation7 + $0x20] sm:$0xf0]  ;;  %v2687_v62 = vor.u32 %v3020_v53, %v2686_v52  ;;  %v2625_v49 = vsel %vm1347_vm8, 1.0, %v3399_v48  ;;  %v2671_v52 = vor.u32 %v3016_v45, %v2670_v43  ;;  %v2707_v53 = vor.u32 %v3025_v47, %v2706_v46  ;;  %v3038_v43 = vld [vmem:[#allocation8 + $0xb8] sm:$0xf0] }
  0xb6   : > { %2416 = vmatmul.msk.bf16.vlgmr.msrb.gmra.mxu0 %vm3551_vm2, %v3398_v28  ;;  %2486 = vmatmul.msk.bf16.vlgmr.msrb.gmra.mxu2 %vm3573_vm6, %v3398_v28  ;;  %v2642_v11 = vor.u32 %v2990_v61, %v2641_v60  ;;  %v2702_v60 = vld [vmem:[#allocation8 + $0x10c] sm:$0xf]  ;;  %v3024_v61 = vld [vmem:[#allocation8 + $0x114] sm:$0xf0]  ;;  %v2872_v46 = vld [vmem:[#allocation8 + $0x170] sm:$0xf] }
  0xb7   : > { %2418 = vmatmul.msk.bf16.vlgmr.msrb.gmra.mxu1 %vm3558_vm3, %v3398_v28  ;;  %2488 = vmatmul.msk.bf16.vlgmr.msrb.gmra.mxu3 %vm3577_vm7, %v3398_v28  ;;  %v2703_v2 = vor.u32 %v3024_v61, %v2702_v60  ;;  %v3046_v47 = vld [vmem:[#allocation8 + $0x178] sm:$0xf0]  ;;  %v3037_v60 = vld [vmem:[#allocation8 + $0xa0] sm:$0xf0]  ;;  %v2880_v61 = vld [vmem:[#allocation8 + $0x1a0] sm:$0xf] }
  0xb8   : > { %1129 = vmatpush.bf16.msra.mxu0 %v2504_v9  ;;  %1283 = vmatpush.bf16.msra.mxu2 %v2572_v10  ;;  %v2763_v9 = vld [vmem:[#allocation8 + $0xa8] sm:$0xf]  ;;  %v3002_v10 = vld [vmem:[#allocation8 + $0xb0] sm:$0xf0]  ;;  %vm1306_vm2 = vcmp.ge.s32.totalorder %v3544_v6, 100  ;;  %vm1309_vm3 = vcmp.lt.s32.totalorder %v3544_v6, 72 }
  0xb9   : > { %1296 = vmatpush.bf16.msra.mxu3 %v2604_v13  ;;  %1142 = vmatpush.bf16.msra.mxu1 %v2536_v14  ;;  %v2647_v13 = vor.u32 %v2993_v0, %v2646_v63  ;;  %v2637_v14 = vld [vmem:[#allocation7] sm:$0xf]  ;;  %v2998_v63 = vld [vmem:[#allocation8 + $0x50] sm:$0xf0] }
  0xba   : > { %v2638_v27 = vor.u32 %v2989_v15, %v2637_v14  ;;  %v2743_v14 = vld [vmem:[#allocation8 + $0x30] sm:$0xf]  ;;  %v2997_v15 = vld [vmem:[#allocation8 + $0x38] sm:$0xf0] }
  0xbb   : > { %v2744_v24 = vor.u32 %v2997_v15, %v2743_v14  ;;  %v2876_v15 = vld [vmem:[#allocation8 + $0x188] sm:$0xf] }
  0xbc   : > { %1130 = vmatpush.bf16.msra.mxu0 %v2500_v21  ;;  %1284 = vmatpush.bf16.msra.mxu2 %v2568_v22  ;;  %v2764_v21 = vor.u32 %v3002_v10, %v2763_v9  ;;  %v3018_v22 = vld [vmem:[#allocation8 + $0x84] sm:$0xf0]  ;;  %v3009_v9 = vld [vmem:[#allocation8 + $0x158] sm:$0xf0] }
  0xbd   : > { %1297 = vmatpush.bf16.msra.mxu3 %v2600_v25  ;;  %1143 = vmatpush.bf16.msra.mxu1 %v2532_v26  ;;  %v2759_v25 = vld [vmem:[#allocation8 + $0x90] sm:$0xf]  ;;  %v3001_v26 = vld [vmem:[#allocation8 + $0x98] sm:$0xf0]  ;;  %v2679_v31 = vor.u32 %v3018_v22, %v2678_v18  ;;  %v2658_v18 = vld [vmem:[#allocation8 + $0x4] sm:$0xf] }
  0xbe   : > { %v2787_v22 = vld [vmem:[#allocation8 + $0x138] sm:$0xf] }
  0xbf   : > { %v2788_v29 = vor.u32 %v3008_v23, %v2787_v22 }
  0xc0   : > { %1131 = vmatpush.bf16.msra.mxu0 %v2496_v34  ;;  %1285 = vmatpush.bf16.msra.mxu2 %v2564_v35  ;;  %v3029_v34 = vld [vmem:[#allocation8 + $0x18c] sm:$0xf0]  ;;  %v2760_v35 = vor.u32 %v3001_v26, %v2759_v25  ;;  %v2694_v25 = vld [vmem:[#allocation8 + $0xdc] sm:$0xf]  ;;  %v3022_v26 = vld [vmem:[#allocation8 + $0xe4] sm:$0xf0] }
  0xc1   : > { %1298 = vmatpush.bf16.msra.mxu3 %v2596_v39  ;;  %1144 = vmatpush.bf16.msra.mxu1 %v2528_v40  ;;  %v3000_v39 = vld [vmem:[#allocation8 + $0x80] sm:$0xf0]  ;;  %v2723_v40 = vor.u32 %v3029_v34, %v2722_v33  ;;  %v2695_v34 = vor.u32 %v3022_v26, %v2694_v25  ;;  %v2828_v25 = vld [vmem:[#allocation8 + $0x68] sm:$0xf]  ;;  %v3035_v26 = vld [vmem:[#allocation8 + $0x70] sm:$0xf0] }
  0xc2   : > { %v2756_v44 = vor.u32 %v3000_v39, %v2755_v38  ;;  %v3021_v38 = vld [vmem:[#allocation8 + $0xcc] sm:$0xf0]  ;;  %v2735_v39 = vld [vmem:[#allocation8] sm:$0xf] }
  0xc4   : > { %1132 = vmatpush.bf16.msra.mxu0 %v2492_v50  ;;  %1286 = vmatpush.bf16.msra.mxu2 %v2560_v51  ;;  %v2751_v50 = vld [vmem:[#allocation8 + $0x60] sm:$0xf]  ;;  %v2999_v51 = vld [vmem:[#allocation8 + $0x68] sm:$0xf0] }
  0xc5   : > { %1299 = vmatpush.bf16.msra.mxu3 %v2592_v54  ;;  %1145 = vmatpush.bf16.msra.mxu1 %v2524_v55  ;;  %v2666_v54 = vld [vmem:[#allocation8 + $0x34] sm:$0xf]  ;;  %v2795_v55 = vld [vmem:[#allocation8 + $0x168] sm:$0xf] }
  0xc6   : > { %v2796_v0 = vor.u32 %v3010_v56, %v2795_v55  ;;  %v2667_v1 = vor.u32 %v3015_v59, %v2666_v54  ;;  %v2836_v55 = vld [vmem:[#allocation8 + $0x98] sm:$0xf]  ;;  %v2799_v56 = vld [vmem:[#allocation8 + $0x180] sm:$0xf]  ;;  %v2873_v59 = vor.u32 %v3046_v47, %v2872_v46  ;;  %v3032_v47 = vld [vmem:[#allocation8 + $0x28] sm:$0xf0] }
  0xc7   : > { %2554 = vmatmul.msk.bf16.vlgmr.msra.gmra.mxu0 %vm3573_vm6, %v3398_v28  ;;  %2622 = vmatmul.msk.bf16.vlgmr.msra.gmra.mxu2 %vm3573_vm6, %v3398_v28  ;;  %v2816_v46 = vld [vmem:[#allocation8 + $0x20] sm:$0xf] }
  0xc8   : > { %1381 = vmatpush.bf16.msrb.mxu0 %v2633_v57  ;;  %1435 = vmatpush.bf16.msrb.mxu2 %v2651_v58  ;;  %v1350_v57 = vpack.c.bf16 %v2625_v49, %v2625_v49  ;;  %v2752_v58 = vor.u32 %v2999_v51, %v2751_v50  ;;  %v3400_v49 = vmov 2   ;;  %v2691_v51 = vor.u32 %v3021_v38, %v2690_v8  ;;  %v2856_v8 = vld [vmem:[#allocation8 + $0x110] sm:$0xf] }
  0xc9   : > { %1646 = vmatpush.bf16.msrb.mxu3 %v2687_v62  ;;  %2556 = vmatmul.msk.bf16.vlgmr.msra.gmra.mxu1 %vm3577_vm7, %v3398_v28  ;;  %v2747_v62 = vld [vmem:[#allocation8 + $0x48] sm:$0xf] }
  0xca   : > { %2624 = vmatmul.msk.bf16.vlgmr.msra.gmra.mxu3 %vm3577_vm7, %v3398_v28  ;;  %1406 = vmatpush.bf16.msrb.mxu1 %v2642_v11  ;;  %v2748_v10 = vor.u32 %v2998_v63, %v2747_v62  ;;  %v3014_v11 = vld [vmem:[#allocation8 + $0x24] sm:$0xf0]  ;;  %v3048_v62 = vld [vmem:[#allocation8 + $0x1a8] sm:$0xf0]  ;;  %v3159_v63 = vld [vmem:[%s3541_s19] sm:$0xff] }
  0xcb   : > { %v2663_v19 = vor.u32 %v3014_v11, %v2662_v3  ;;  %3150 = vset.pattern.permute.xlu2 %v3400_v49  ;;  %v2837_v11 = vor.u32 %v3037_v60, %v2836_v55  ;;  %v2848_v49 = vld [vmem:[#allocation8 + $0xe0] sm:$0xf]  ;;  %v2844_v55 = vld [vmem:[#allocation8 + $0xc8] sm:$0xf] }
  0xcc   : > { %1382 = vmatpush.bf16.msrb.mxu0 %v2629_v12  ;;  %1436 = vmatpush.bf16.msrb.mxu2 %v2647_v13  ;;  %v2698_v12 = vld [vmem:[#allocation8 + $0xf4] sm:$0xf]  ;;  %v3023_v13 = vld [vmem:[#allocation8 + $0xfc] sm:$0xf0] }
  0xcd   : > { %1647 = vmatpush.bf16.msrb.mxu3 %v2683_v16  ;;  %v2792_v16 = vor.u32 %v3009_v9, %v2791_v4  ;;  %v2699_v20 = vor.u32 %v3023_v13, %v2698_v12  ;;  %1313 = vperm.xlu2 %3150, %v3159_v63   ;;  %v2775_v4 = vld [vmem:[#allocation8 + $0xf0] sm:$0xf]  ;;  %v3005_v9 = vld [vmem:[#allocation8 + $0xf8] sm:$0xf0]  ;;  %v2832_v12 = vld [vmem:[#allocation8 + $0x80] sm:$0xf]  ;;  %v2881_v13 = vor.u32 %v3048_v62, %v2880_v61 }
  0xce   : > { %1407 = vmatpush.bf16.msrb.mxu1 %v2638_v27  ;;  %v2739_v27 = vld [vmem:[#allocation8 + $0x18] sm:$0xf] }
  0xd0   : > { %1659 = vmatpush.bf16.msra.mxu0 %v2719_v17  ;;  %1793 = vmatpush.bf16.msra.mxu2 %v2764_v21  ;;  %v1447_v17 = vadd.s32 256, %v3544_v6  ;;  %v3013_v21 = vld [vmem:[#allocation8 + $0xc] sm:$0xf0] }
  0xd1   : > { %1648 = vmatpush.bf16.msrb.mxu3 %v2679_v31  ;;  %v2996_v31 = vld [vmem:[#allocation8 + $0x20] sm:$0xf0]  ;;  %v2659_v33 = vor.u32 %v3013_v21, %v2658_v18  ;;  %v2864_v18 = vld [vmem:[#allocation8 + $0x140] sm:$0xf] }
  0xd2   : > { %1678 = vmatpush.bf16.msra.mxu1 %v2727_v30  ;;  %v1450_v30 = vpop.permute.xlu1 %1449  ;;  %v2740_v37 = vor.u32 %v2996_v31, %v2739_v27  ;;  %v3004_v21 = vld [vmem:[#allocation8 + $0xe0] sm:$0xf0]  ;;  %v3043_v31 = vld [vmem:[#allocation8 + $0x130] sm:$0xf0] }
  0xd3   : > { %vm1453_vm10 = vcmp.eq.s32.totalorder %v1450_v30, %v1447_v17  ;;  %vm1451_vm11 = vcmp.eq.s32.totalorder %v1450_v30, %v3544_v6  ;;  %vm1452_vm13 = vcmp.eq.s32.totalorder %v1450_v30, %v3547_v7  ;;  %v3036_v7 = vld [vmem:[#allocation8 + $0x88] sm:$0xf0]  ;;  %v2776_v17 = vor.u32 %v3005_v9, %v2775_v4  ;;  %v2860_v30 = vld [vmem:[#allocation8 + $0x128] sm:$0xf] }
  0xd4   : > { %1660 = vmatpush.bf16.msra.mxu0 %v2715_v5  ;;  %1794 = vmatpush.bf16.msra.mxu2 %v2760_v35  ;;  %v2803_v5 = vld [vmem:[#allocation8 + $0x198] sm:$0xf]  ;;  %v2783_v35 = vld [vmem:[#allocation8 + $0x120] sm:$0xf]  ;;  %vm3613_vm12 = vmpackc.low %vm1451_vm11, %vm1451_vm11  ;;  %v2833_v22 = vor.u32 %v3036_v7, %v2832_v12 }
  0xd5   : > { %1649 = vmatpush.bf16.msrb.mxu3 %v2675_v41  ;;  %v2804_v41 = vor.u32 %v3012_v32, %v2803_v5  ;;  %v2784_v45 = vor.u32 %v3007_v36, %v2783_v35  ;;  %vm3627_vm14 = vmpackc.low %vm1452_vm13, %vm1452_vm13  ;;  %v2767_v5 = vld [vmem:[#allocation8 + $0xc0] sm:$0xf]  ;;  %v3003_v32 = vld [vmem:[#allocation8 + $0xc8] sm:$0xf0] }
  0xd6   : > { %1679 = vmatpush.bf16.msra.mxu1 %v2723_v40  ;;  %v2995_v40 = vld [vmem:[#allocation8 + $0x8] sm:$0xf0]  ;;  %v3034_v35 = vld [vmem:[#allocation8 + $0x58] sm:$0xf0]  ;;  %v2768_v36 = vor.u32 %v3003_v32, %v2767_v5  ;;  %v3154_v5 = vld [vmem:[%s3757_s3 + $0x2] ss:$0 sm:$0xff] }
  0xd7   : > { %2634 = vmatmul.msk.bf16.vlgmr.msrb.gmra.mxu0 %vm1371_vm9, %v1350_v57  ;;  %2652 = vmatmul.msk.bf16.vlgmr.msrb.gmra.mxu2 %vm1371_vm9, %v1350_v57 }
  0xd8   : > { %1661 = vmatpush.bf16.msra.mxu0 %v2711_v42  ;;  %1795 = vmatpush.bf16.msra.mxu2 %v2756_v44  ;;  %v2840_v42 = vld [vmem:[#allocation8 + $0xb0] sm:$0xf]  ;;  %v2655_v44 = vsel %vm1453_vm10, 1.0, %v3399_v48  ;;  %v2736_v48 = vor.u32 %v2995_v40, %v2735_v39  ;;  %v2820_v40 = vld [vmem:[#allocation8 + $0x38] sm:$0xf] }
  0xd9   : > { %1650 = vmatpush.bf16.msrb.mxu3 %v2671_v52  ;;  %2643 = vmatmul.msk.bf16.vlgmr.msrb.gmra.mxu1 %vm1371_vm9, %v1350_v57  ;;  %v2779_v52 = vld [vmem:[#allocation8 + $0x108] sm:$0xf]  ;;  %v2841_v54 = vor.u32 %v3038_v43, %v2840_v42  ;;  %v3011_v57 = vld [vmem:[#allocation8 + $0x188] sm:$0xf0]  ;;  %v2852_v42 = vld [vmem:[#allocation8 + $0xf8] sm:$0xf] }
  0xda   : > { %1806 = vmatpush.bf16.msrb.mxu1 %v2796_v0  ;;  %v3041_v43 = vld [vmem:[#allocation8 + $0x100] sm:$0xf0] }
  0xdc   : > { %1662 = vmatpush.bf16.msra.mxu0 %v2707_v53  ;;  %1796 = vmatpush.bf16.msra.mxu2 %v2752_v58  ;;  %v3006_v53 = vld [vmem:[#allocation8 + $0x110] sm:$0xf0]  ;;  %v3618_v58 = vpack.c.bf16 %v2655_v44, %v2655_v44 }
  0xdd   : > { %1651 = vmatpush.bf16.msrb.mxu3 %v2667_v1  ;;  %v2780_v0 = vor.u32 %v3006_v53, %v2779_v52  ;;  %v2868_v1 = vld [vmem:[#allocation8 + $0x158] sm:$0xf]  ;;  %v2817_v52 = vor.u32 %v3032_v47, %v2816_v46 }
  0xde   : > { %1807 = vmatpush.bf16.msrb.mxu1 %v2792_v16  ;;  %v3047_v16 = vld [vmem:[#allocation8 + $0x190] sm:$0xf0] }
  0xdf   : > { %v2877_v23 = vor.u32 %v3047_v16, %v2876_v15 }
  0xe0   : > { %1663 = vmatpush.bf16.msra.mxu0 %v2703_v2  ;;  %1797 = vmatpush.bf16.msra.mxu2 %v2748_v10  ;;  %v3045_v2 = vld [vmem:[#allocation8 + $0x160] sm:$0xf0]  ;;  %v2800_v10 = vor.u32 %v3011_v57, %v2799_v56  ;;  %v3039_v56 = vld [vmem:[#allocation8 + $0xd0] sm:$0xf0] }
  0xe1   : > { %1652 = vmatpush.bf16.msrb.mxu3 %v2663_v19  ;;  %v2869_v14 = vor.u32 %v3045_v2, %v2868_v1  ;;  %v3044_v19 = vld [vmem:[#allocation8 + $0x148] sm:$0xf0] }
  0xe2   : > { %1808 = vmatpush.bf16.msrb.mxu1 %v2788_v29  ;;  %v2829_v29 = vor.u32 %v3035_v26, %v2828_v25 }
  0xe4   : > { %1664 = vmatpush.bf16.msra.mxu0 %v2699_v20  ;;  %1798 = vmatpush.bf16.msra.mxu2 %v2744_v24  ;;  %v2771_v20 = vld [vmem:[#allocation8 + $0xd8] sm:$0xf]  ;;  %v2865_v24 = vor.u32 %v3044_v19, %v2864_v18 }
  0xe5   : > { %1653 = vmatpush.bf16.msrb.mxu3 %v2659_v33  ;;  %v2772_v27 = vor.u32 %v3004_v21, %v2771_v20  ;;  %v2861_v33 = vor.u32 %v3043_v31, %v2860_v30  ;;  %v3153_v20 = vld [vmem:[%s3757_s3 + $0x1] ss:$0 sm:$0xff] }
  0xe6   : > { %1809 = vmatpush.bf16.msrb.mxu1 %v2784_v45  ;;  %v2853_v45 = vor.u32 %v3041_v43, %v2852_v42 }
  0xe8   : > { %1665 = vmatpush.bf16.msra.mxu0 %v2695_v34  ;;  %1799 = vmatpush.bf16.msra.mxu2 %v2740_v37  ;;  %v2824_v34 = vld [vmem:[#allocation8 + $0x50] sm:$0xf]  ;;  %v3042_v37 = vld [vmem:[#allocation8 + $0x118] sm:$0xf0] }
  0xe9   : > { %1825 = vmatpush.bf16.msra.mxu3 %v2804_v41  ;;  %2732 = vmatmul.msk.bf16.vlgmr.msra.gmra.mxu1 %vm1371_vm9, %v3618_v58  ;;  %v2825_v38 = vor.u32 %v3034_v35, %v2824_v34  ;;  %v2857_v39 = vor.u32 %v3042_v37, %v2856_v8  ;;  %v3033_v41 = vld [vmem:[#allocation8 + $0x40] sm:$0xf0]  ;;  %v3155_v34 = vld [vmem:[%s3757_s3 + $0x3] ss:$0 sm:$0xff] }
  0xea   : > { %2729 = vmatmul.msk.bf16.vlgmr.msrb.gmra.mxu3 %vm3613_vm12, %v3398_v28  ;;  %1810 = vmatpush.bf16.msrb.mxu1 %v2780_v0  ;;  %v2821_v44 = vor.u32 %v3033_v41, %v2820_v40 }
  0xec   : > { %1666 = vmatpush.bf16.msra.mxu0 %v2691_v51  ;;  %1800 = vmatpush.bf16.msra.mxu2 %v2736_v48  ;;  %v3040_v51 = vld [vmem:[#allocation8 + $0xe8] sm:$0xf0]  ;;  %v2812_v48 = vld [vmem:[#allocation8 + $0x8] sm:$0xf] }
  0xed   : > { %1826 = vmatpush.bf16.msra.mxu3 %v2800_v10  ;;  %v2849_v53 = vor.u32 %v3040_v51, %v2848_v49 }
  0xee   : > { %1811 = vmatpush.bf16.msrb.mxu1 %v2776_v17  ;;  %v3152_v17 = vld [vmem:[%s3757_s3] ss:$0 sm:$0xff] }
  0xef   : > { %2731 = vmatmul.msk.bf16.vlgmr.msra.gmra.mxu0 %vm3627_vm14, %v3398_v28  ;;  %2806 = vmatmul.msk.bf16.vlgmr.msra.gmra.mxu2 %vm3613_vm12, %v3398_v28 }
  0xf0   : > { %1976 = vmatpush.bf16.msrb.mxu0 %v2841_v54  ;;  %1989 = vmatpush.bf16.msrb.mxu2 %v2873_v59  ;;  %v3031_v54 = vld [vmem:[#allocation8 + $0x10] sm:$0xf0]  ;;  %v2845_v59 = vor.u32 %v3039_v56, %v2844_v55 }
  0xf1   : > { %2008 = vmatpush.bf16.msrb.mxu3 %v2881_v13  ;;  %v2813_v57 = vor.u32 %v3031_v54, %v2812_v48 }
  0xf2   : > { %1812 = vmatpush.bf16.msrb.mxu1 %v2772_v27 }
  0xf4   : > { %1977 = vmatpush.bf16.msrb.mxu0 %v2837_v11  ;;  %1990 = vmatpush.bf16.msrb.mxu2 %v2869_v14 }
  0xf5   : > { %2009 = vmatpush.bf16.msrb.mxu3 %v2877_v23 }
  0xf6   : > { %1813 = vmatpush.bf16.msrb.mxu1 %v2768_v36 }
  0xf8   : > { %1978 = vmatpush.bf16.msrb.mxu0 %v2833_v22  ;;  %1991 = vmatpush.bf16.msrb.mxu2 %v2865_v24 }
  0xf9   : > { %2808 = vmatmul.msk.bf16.vlgmr.msrb.gmra.mxu1 %vm3627_vm14, %v3398_v28 }
  0xfa   : > { %2809 = vmatmul.msk.bf16.vlgmr.msra.gmra.mxu3 %vm1371_vm9, %v3618_v58 }
  0xfc   : > { %1979 = vmatpush.bf16.msrb.mxu0 %v2829_v29  ;;  %1992 = vmatpush.bf16.msrb.mxu2 %v2861_v33 }
 0x100   : > { %1980 = vmatpush.bf16.msrb.mxu0 %v2825_v38  ;;  %1993 = vmatpush.bf16.msrb.mxu2 %v2857_v39  ;;  %v3156_v39 = vld [vmem:[%s3757_s3 + $0x4] ss:$0 sm:$0xff] }
 0x104   : > { %1981 = vmatpush.bf16.msrb.mxu0 %v2821_v44  ;;  %1994 = vmatpush.bf16.msrb.mxu2 %v2853_v45 }
 0x108   : > { %1982 = vmatpush.bf16.msrb.mxu0 %v2817_v52  ;;  %1995 = vmatpush.bf16.msrb.mxu2 %v2849_v53 }
 0x10a   : > { %2886 = vmatmul.msk.bf16.vlgmr.msrb.gmra.mxu3 %vm1371_vm9, %v3618_v58 }
 0x10c   : > { %1983 = vmatpush.bf16.msrb.mxu0 %v2813_v57  ;;  %1996 = vmatpush.bf16.msrb.mxu2 %v2845_v59 }
 0x10f   : > { %2883 = vmatmul.msk.bf16.vlgmr.msrb.gmra.mxu0 %vm3613_vm12, %v3398_v28  ;;  %2885 = vmatmul.msk.bf16.vlgmr.msrb.gmra.mxu2 %vm3627_vm14, %v3398_v28 }
 0x123   : > { %v537_v60 = vpop.f32.mrf.mxu0 }
 0x124   : > { %v550_v61 = vpop.f32.mrf.mxu1 }
 0x125   : > { %v551_v15 = vadd.f32 %v550_v61, %v537_v60 }
 0x127   : > { %v3652_v7 = vpop.permute.xlu2 %1313 }
 0x128   : > { %vm1315_vm15 = vcmp.eq.s32.totalorder %v3652_v7, 0  ;;  %vm1319_vm0 = vcmp.eq.s32.totalorder %v3652_v7, 1  ;;  %vm1323_vm1 = vcmp.eq.s32.totalorder %v3652_v7, 2  ;;  %vm1327_vm5 = vcmp.eq.s32.totalorder %v3652_v7, 3 }
 0x129   : > { %v659_v62 = vpop.f32.mrf.mxu2  ;;  %v1318_v22 = vsel %vm1315_vm15, %v3152_v17, 0.0  ;;  %vm1331_vm6 = vcmp.eq.s32.totalorder %v3652_v7, 4 }
 0x12a   : > { %v672_v63 = vpop.f32.mrf.mxu3  ;;  %v660_v18 = vadd.f32 %v659_v62, %v551_v15  ;;  %v1322_v32 = vsel %vm1319_vm0, %v3153_v20, %v1318_v22 }
 0x12b   : > { %v539_v0 = vpop.f32.mrf.mxu0  ;;  %v1326_v8 = vsel %vm1323_vm1, %v3154_v5, %v1322_v32 }
 0x12c   : > { %v552_v1 = vpop.f32.mrf.mxu1  ;;  %v673_v26 = vadd.f32 %v672_v63, %v660_v18  ;;  %v1330_v41 = vsel %vm1327_vm5, %v3155_v34, %v1326_v8 }
 0x131   : > { %v661_v2 = vpop.f32.mrf.mxu2 }
 0x132   : > { %v674_v4 = vpop.f32.mrf.mxu3 }
 0x133   : > { %v813_v9 = vpop.f32.mrf.mxu0 }
 0x134   : > { %v826_v10 = vpop.f32.mrf.mxu1 }
 0x135   : > { %v827_v23 = vadd.f32 %v826_v10, %v813_v9 }
 0x137   : > { %v830_v33 = vadd.f32 %v827_v23, %v673_v26 }
 0x139   : > { %v1012_v58 = vpop.f32.mrf.mxu2 }
 0x13a   : > { %v1025_v11 = vpop.f32.mrf.mxu3 }
 0x13b   : > { %v815_v50 = vpop.f32.mrf.mxu0  ;;  %v1026_v16 = vadd.f32 %v1025_v11, %v1012_v58 }
 0x13c   : > { %v828_v12 = vpop.f32.mrf.mxu1 }
 0x141   : > { %v1014_v13 = vpop.f32.mrf.mxu2 }
 0x142   : > { %v1027_v14 = vpop.f32.mrf.mxu3 }
 0x144   : > { %v1134_v3 = vpop.f32.mrf.mxu0 }
 0x145   : > { %v1135_v19 = vadd.f32 %v1134_v3, %v1026_v16 }
 0x146   : > { %v1147_v28 = vpop.f32.mrf.mxu1 }
 0x147   : > { %v1148_v27 = vadd.f32 %v1147_v28, %v1135_v19 }
 0x14a   : > { %v1288_v21 = vpop.f32.mrf.mxu2 }
 0x14c   : > { %v1136_v25 = vpop.f32.mrf.mxu0 }
 0x14d   : > { %v1301_v24 = vpop.f32.mrf.mxu3 }
 0x14e   : > { %v1302_v30 = vadd.f32 %v1301_v24, %v1288_v21  ;;  %v1149_v31 = vpop.f32.mrf.mxu1 }
 0x150   : > { %v1305_v29 = vadd.f32 %v1302_v30, %v1148_v27 }
 0x152   : > { %v1307_v35 = vsel %vm1306_vm2, %v1305_v29, 0.0  ;;  %v1310_v36 = vsel %vm1309_vm3, %v1305_v29, 0.0  ;;  %v1290_v38 = vpop.f32.mrf.mxu2 }
 0x153   : > { %v1308_v37 = vadd.f32 %v1307_v35, %v830_v33  ;;  %2024 = vst.msk [vmem:[%s340_s1 + $0x8] sm:$0xff] %vm2023_vm4, %v1310_v36 }
 0x155   : > { %v1303_v40 = vpop.f32.mrf.mxu3  ;;  %2022 = vst [vmem:[%s340_s1] sm:$0xff] %v1308_v37 }
 0x156   : > { %v1409_v42 = vpop.f32.mrf.mxu1 }
 0x157   : > { %3307 = shalt.err (!%p3304_p8)
}
 0x158   : > { %3068 = dma.vmem_to_hbm [thread:$0]  (%p3479_p5), %s2049_s2, 256, %s2051_s10, %s2030_s8   ;;  %v1384_v43 = vpop.f32.mrf.mxu0  ;;  %v3157_v44 = vld [vmem:[%s3757_s3 + $0x5] ss:$0 sm:$0xff]  ;;  %v1334_v45 = vsel %vm1331_vm6, %v3156_v39, %v1330_v41  ;;  %vm1335_vm7 = vcmp.eq.s32.totalorder %v3652_v7, 5  ;;  %v3158_v47 = vld [vmem:[%s3757_s3 + $0x6] ss:$0 sm:$0xff] }
 0x159   : > { %v1410_v46 = vadd.f32 %v1409_v42, %v1384_v43  ;;  %v1338_v49 = vsel %vm1335_vm7, %v3157_v44, %v1334_v45  ;;  %vm1339_vm8 = vcmp.eq.s32.totalorder %v3652_v7, 6  ;;  %s3050_s20 = smul.u32 24, %s3659_s29  ;;  %vm2016_vm9 = vcmp.ge.s32.totalorder %v3544_v6, 72  ;;  %s2035_s15 = scalar_lea.sflag [#allocation12], %s3659_s29 }
 0x15a   : > { %v1438_v51 = vpop.f32.mrf.mxu2  ;;  %v1342_v52 = vsel %vm1339_vm8, %v3158_v47, %v1338_v49  ;;  %s3051_s10 = smul.u32 24, %s3462_s28  ;;  %vm2019_vm10 = vcmp.lt.s32.totalorder %v3544_v6, 44  ;;  %vm2027_vm11 = vcmask 359424   ;;  %s3328_s22 = scalar_lea.hbm %s3761_s7, 48 }
 0x15b   : > { %v1442_v53 = vadd.f32 %v1438_v51, %v1410_v46  ;;  %s3712_s2 = scalar_lea.vmem [#allocation11], %s3050_s20 }
 0x15c   : > { %s2061_s9 = scalar_lea.hbm %s3761_s7, %s3051_s10  ;;  %s2063_s28 = sshll.u32 %s3712_s2, 4  ;;  %s2064_s28 = int_to_ptr.vmem [resolvable:$true] %s2063_s28 }
 0x15d   : > { %v1443_v55 = vsel %vm1306_vm2, %v1442_v53, 0.0  ;;  %s2065_s14 = sshll.u32 %s2061_s9, 4  ;;  %v1445_v20 = vsel %vm1309_vm3, %v1442_v53, 0.0  ;;  %s2066_s14 = int_to_ptr.hbm [resolvable:$true] %s2065_s14 }
 0x15e   : > { %v1411_v48 = vpop.f32.mrf.mxu1  ;;  %v1444_v56 = vadd.f32 %v1443_v55, %v1342_v52  ;;  %s3322_s17 = sshra.s32 %s2066_s14, 4  ;;  %s3323_s17 = int_to_ptr.hbm [resolvable:$true] %s3322_s17 }
 0x15f   : > { %s3324_s18 = scalar_lea.hbm %s3323_s17, 24  ;;  %p3329_p12 = scmp.lt.s32.totalorder %s3323_s17, %s3761_s7 }
 0x160   : > { %v1386_v54 = vpop.f32.mrf.mxu0  ;;  %2025 = vst [vmem:[%s3712_s2] sm:$0xff] %v1444_v56  ;;  %p3325_p9 = scmp.ne.s32.totalorder %s3323_s17, %s3324_s18  ;;  %p3330_p13 = scmp.lt.s32.totalorder %s3328_s22, %s3324_s18 }
 0x162   : > { %v1440_v57 = vpop.f32.mrf.mxu2  ;;  %p3326_p10 = pnand %p3325_p9, %p3479_p5  ;;  %p3331_p0 = por %p3330_p13, %p3329_p12 }
 0x164   : > { %p3327_p11 = pneg %p3326_p10 }
 0x166   : > { %v1681_v59 = vpop.f32.mrf.mxu1  ;;  %p3332_p1 = pnand %p3331_p0, %p3327_p11 }
 0x16c   : > { %v1668_v60 = vpop.f32.mrf.mxu0 }
 0x16d   : > { %v1655_v61 = vpop.f32.mrf.mxu3 }
 0x16e   : > { %v1683_v63 = vpop.f32.mrf.mxu1  ;;  %v1669_v58 = vadd.f32 %v1668_v60, %v1655_v61 }
 0x170   : > { %v1682_v50 = vadd.f32 %v1681_v59, %v1669_v58 }
 0x172   : > { %v1802_v62 = vpop.f32.mrf.mxu2 }
 0x173   : > { %v1803_v13 = vadd.f32 %v1802_v62, %v1682_v50 }
 0x174   : > { %v1670_v0 = vpop.f32.mrf.mxu0 }
 0x175   : > { %v1657_v1 = vpop.f32.mrf.mxu3 }
 0x176   : > { %v1815_v4 = vpop.f32.mrf.mxu1 }
 0x177   : > { %v1816_v3 = vadd.f32 %v1815_v4, %v1803_v13 }
 0x17a   : > { %v1804_v2 = vpop.f32.mrf.mxu2 }
 0x17d   : > { %v1828_v9 = vpop.f32.mrf.mxu3 }
 0x17e   : > { %v1817_v10 = vpop.f32.mrf.mxu1  ;;  %v1829_v16 = vadd.f32 %v1828_v9, %v1816_v3 }
 0x185   : > { %v1830_v11 = vpop.f32.mrf.mxu3 }
 0x18c   : > { %v1985_v12 = vpop.f32.mrf.mxu0 }
 0x18d   : > { %v2011_v14 = vpop.f32.mrf.mxu3 }
 0x192   : > { %v1998_v28 = vpop.f32.mrf.mxu2 }
 0x193   : > { %v1999_v7 = vadd.f32 %v1998_v28, %v1985_v12 }
 0x194   : > { %v1987_v15 = vpop.f32.mrf.mxu0 }
 0x195   : > { %v2012_v17 = vadd.f32 %v2011_v14, %v1999_v7  ;;  %v2013_v19 = vpop.f32.mrf.mxu3 }
 0x197   : > { %v2015_v18 = vadd.f32 %v2012_v17, %v1829_v16 }
 0x199   : > { %v2017_v21 = vsel %vm2016_vm9, %v2015_v18, 0.0  ;;  %v2020_v22 = vsel %vm2019_vm10, %v2015_v18, 0.0 }
 0x19a   : > { %v2018_v23 = vadd.f32 %v2017_v21, %v1445_v20  ;;  %2028 = vst.msk [vmem:[%s3712_s2 + $0x10] sm:$0xff] %vm2027_vm11, %v2020_v22  ;;  %v2000_v24 = vpop.f32.mrf.mxu2 }
 0x19c   : > { %2026 = vst [vmem:[%s3712_s2 + $0x8] sm:$0xff] %v2018_v23 }
 0x19d   : > { %3335 = shalt.err (!%p3332_p1)
}
 0x19e   : > { %3069 = dma.vmem_to_hbm [thread:$0]  (%p3479_p5), %s2064_s28, 384, %s2066_s14, %s2035_s15  }
 0x19f PF: > { %p3100_p2 = scmp.ge.s32.totalorder %s3386_s27, 2  ;;  %s2077_s29 = sand.u32 1, %s3374_s24  }
 0x1a0   : > { %s2078_s19 = scalar_lea.sflag [#allocation4], %s2077_s29 }
 0x1a1   : > { %p3086_p3 = pnand %p3100_p2, %p3483_p6 }
 0x1a3   : > { %p3087_p4 = pneg %p3086_p3 }
 0x1a5   : > { %3365 = dma.done.wait (%p3087_p4), %s2078_s19, 256  }
 0x1a6   : > { %3367 = vsyncadd (%p3087_p4), %s2078_s19, 4294967040  ;;  %s2088_s20 = scalar_lea.sflag [#allocation12], %s2077_s29 }
 0x1a7   : > { %3369 = dma.done.wait (%p3087_p4), %s2088_s20, 384  }
 0x1a8   : > { %3371 = vsyncadd (%p3087_p4), %s2088_s20, 4294966912  ;;  %s3783_s11 = sld [smem:[#allocation18_spill]]  ;;  %p24_p5 = scmp.ge.s32.totalorder %s3466_s30, 4  }
 0x1a9   : > { %s3784_s24 = smov %s3378_s25  ;;  %s3785_s25 = smov %s3382_s26 }
 0x1aa   : > { %s3787_s27 = smov %s3466_s30  ;;  %26 = sbr.rel (!%p24_p5) target bundleno = 11 (0xb), region = 113 }
 0x1ae   : > { %s3786_s26 = smov %s3783_s11 }
 0x1af   :  { %2094 = vsyncpa [#allocation3], 1 }
 0x1b0   :  { %2096 = vsyncpa [#allocation3 + $0x1], 1 }
 0x1b1   :  { %2097 = vsyncpa [#allocation6], 1 }
 0x1b2   :  { %2098 = vsyncpa [#allocation9], 1 }
 0x1b3   :  { %2099 = vsyncpa [#allocation4], 1 }
 0x1b4   :  { %2101 = vsyncpa [#allocation4 + $0x1], 1 }
 0x1b5   :  { %2102 = vsyncpa [#allocation12], 1 }
 0x1b6   :  { %2104 = vsyncpa [#allocation12 + $0x1], 1 }

</bundles_post_ra>
